<compile_context>
chip_gen: v5e
topology: v5e:2x2
jax: 0.10.0
libtpu: 0.0.40
codegen_flags: <defaults>
</compile_context>

<pallas_src>
import math

import jax
import jax.numpy as jnp
from jax.experimental import pallas as pl
from jax.experimental.pallas import tpu as pltpu

STATE_SIZE = 6      # HIVPatient observation dim
ACTION_SIZE = 4     # HIVPatient action-space size
HIDDEN = 256
IN_PAD = 8          # first-layer contraction dim padded to the sublane tile
HEAD_PAD = 128      # output lanes padded to the lane width
N_HIDDEN = 6        # number of 256->256 hidden layers after the input layer


def _round_up(x, m):
    return ((x + m - 1) // m) * m


def mlp_kernel(x_ref, w1_ref, wh_ref, bh_ref, wo_ref, bo_ref, out_ref):
    """One batch tile: 7x (Linear+ReLU) then the output Linear, all in VMEM."""
    bh = bh_ref[...]                                           # (7, 256) f32

    # layer 1: (bt, 8) @ (8, 256) -- bf16 MXU, f32 accumulate
    h = jnp.dot(x_ref[...].astype(jnp.bfloat16), w1_ref[...],
                preferred_element_type=jnp.float32)
    # bias+ReLU in f32, then stage the activation in bf16 (half the VMEM
    # vst/vld bytes and vreg pressure per layer; numerically identical to
    # casting right before the next dot).
    h = jnp.maximum(h + bh[0:1, :], 0.0).astype(jnp.bfloat16)

    # six 256->256 layers, statically unrolled; wh_ref[i] is a static index
    for i in range(N_HIDDEN):
        h = jnp.dot(h, wh_ref[i], preferred_element_type=jnp.float32)
        h = jnp.maximum(h + bh[i + 1:i + 2, :], 0.0).astype(jnp.bfloat16)

    # output head: (bt, 256) @ (256, 128); cols ACTION_SIZE.. carry zero W/b
    out_ref[...] = jnp.dot(h, wo_ref[...],
                           preferred_element_type=jnp.float32) + bo_ref[...]


def init_params(key):
    """Deterministic parameters matching the torch module's layer shapes.

    Weights are stored transposed as (in, out) so every layer is `h @ W + b`,
    and cast to bf16 (the perf-critical HBM bytes); biases stay f32.
    """
    kw = jax.random.split(key, 8)
    kb = jax.random.split(jax.random.fold_in(key, 1), 8)

    def linear_w(k, fan_in, fan_out):
        bound = 1.0 / math.sqrt(fan_in)       # torch default Linear init range
        return jax.random.uniform(k, (fan_in, fan_out), jnp.float32,
                                  -bound, bound)

    def linear_b(k, fan_in, n):
        bound = 1.0 / math.sqrt(fan_in)
        return jax.random.uniform(k, (n,), jnp.float32, -bound, bound)

    # layer 1: state_size -> 256, contraction dim padded 6 -> 8 with zeros
    w1 = jnp.zeros((IN_PAD, HIDDEN), jnp.float32)
    w1 = w1.at[:STATE_SIZE, :].set(linear_w(kw[0], STATE_SIZE, HIDDEN))

    # layers 2..7: 256 -> 256, packed into one array
    wh = jnp.stack([linear_w(kw[1 + i], HIDDEN, HIDDEN)
                    for i in range(N_HIDDEN)])                  # (6, 256, 256)

    # hidden biases packed: row 0 is layer-1 bias, rows 1..6 the 256->256 ones
    bh = jnp.stack([linear_b(kb[0], STATE_SIZE, HIDDEN)] +
                   [linear_b(kb[1 + i], HIDDEN, HIDDEN)
                    for i in range(N_HIDDEN)])                  # (7, 256)

    # output layer: 256 -> action_size, lane-padded to 128 (pad cols zero)
    wo = jnp.zeros((HIDDEN, HEAD_PAD), jnp.float32)
    wo = wo.at[:, :ACTION_SIZE].set(linear_w(kw[7], HIDDEN, ACTION_SIZE))
    bo = jnp.zeros((1, HEAD_PAD), jnp.float32)
    bo = bo.at[0, :ACTION_SIZE].set(linear_b(kb[7], HIDDEN, ACTION_SIZE))

    return (w1.astype(jnp.bfloat16), wh.astype(jnp.bfloat16), bh,
            wo.astype(jnp.bfloat16), bo)


def qnetwork_forward(x, params, *, batch_tile=512):
    """x: (B, STATE_SIZE) float32  ->  (B, ACTION_SIZE) float32."""
    assert x.ndim == 2 and x.shape[1] == STATE_SIZE
    w1, wh, bh, wo, bo = params
    batch = x.shape[0]

    # Batch tile: multiple of 8 (sublane rule), capped at ceil(batch/2) so the
    # ("parallel",) batch axis yields >=2 grid steps whenever batch > 8 and
    # v7x can shard it across both TensorCores.
    batch8 = _round_up(batch, 8)
    half = _round_up(pl.cdiv(batch8, 2), 8)
    bt = max(8, min(_round_up(batch_tile, 8), half))
    b_pad = _round_up(batch8, bt)
    grid = (b_pad // bt,)

    # Single fused pad (batch rows to b_pad, feature 6 -> 8); cheaper than a
    # zeros + dynamic-update-slice round trip.
    x_pad = jnp.pad(x, ((0, b_pad - batch), (0, IN_PAD - STATE_SIZE)))

    flops = 2 * b_pad * (IN_PAD * HIDDEN
                         + N_HIDDEN * HIDDEN * HIDDEN
                         + HIDDEN * HEAD_PAD)
    bytes_accessed = ((w1.size + wh.size + wo.size) * 2      # bf16 weights
                      + (bh.size + bo.size) * 4              # f32 biases
                      + x_pad.size * 4 + b_pad * HEAD_PAD * 4)

    out_pad = pl.pallas_call(
        mlp_kernel,
        out_shape=jax.ShapeDtypeStruct((b_pad, HEAD_PAD), jnp.float32),
        grid=grid,
        in_specs=[
            pl.BlockSpec((bt, IN_PAD), lambda i: (i, 0)),             # x tile
            pl.BlockSpec((IN_PAD, HIDDEN), lambda i: (0, 0)),         # w1
            pl.BlockSpec((N_HIDDEN, HIDDEN, HIDDEN),
                         lambda i: (0, 0, 0)),                        # wh
            pl.BlockSpec((N_HIDDEN + 1, HIDDEN), lambda i: (0, 0)),   # bh
            pl.BlockSpec((HIDDEN, HEAD_PAD), lambda i: (0, 0)),       # wo
            pl.BlockSpec((1, HEAD_PAD), lambda i: (0, 0)),            # bo
        ],
        out_specs=pl.BlockSpec((bt, HEAD_PAD), lambda i: (i, 0)),
        compiler_params=pltpu.CompilerParams(
            dimension_semantics=("parallel",)),
        cost_estimate=pl.CostEstimate(flops=flops, transcendentals=0,
                                      bytes_accessed=bytes_accessed),
    )(x_pad, w1, wh, bh, wo, bo)

    return out_pad[:batch, :ACTION_SIZE]


def qnetwork_forward_ref(x, params):
    """Pure-JAX reference mirroring the kernel math (bf16 weights/activations,
    f32 accumulation)."""
    w1, wh, bh, wo, bo = params
    batch = x.shape[0]
    xp = jnp.pad(x, ((0, 0), (0, IN_PAD - STATE_SIZE)))
    h = jnp.dot(xp.astype(jnp.bfloat16), w1, preferred_element_type=jnp.float32)
    h = jnp.maximum(h + bh[0:1, :], 0.0).astype(jnp.bfloat16)
    for i in range(N_HIDDEN):
        h = jnp.dot(h, wh[i], preferred_element_type=jnp.float32)
        h = jnp.maximum(h + bh[i + 1:i + 2, :], 0.0).astype(jnp.bfloat16)
    out = jnp.dot(h, wo, preferred_element_type=jnp.float32) + bo
    return out[:batch, :ACTION_SIZE]


if __name__ == "__main__":
    key = jax.random.PRNGKey(0)
    pkey, xkey1, xkey2 = jax.random.split(key, 3)

    params = init_params(pkey)

    # small batch (grid = 1)
    x_small = jax.random.normal(xkey1, (8, STATE_SIZE), dtype=jnp.float32)
    q_small = jax.block_until_ready(qnetwork_forward(x_small, params))
    q_small_ref = qnetwork_forward_ref(x_small, params)
    assert q_small.shape == (8, ACTION_SIZE)
    assert jnp.allclose(q_small, q_small_ref, atol=5e-3, rtol=5e-3), \
        "small-batch mismatch vs JAX reference"

    # larger batch (exercises batch padding and the grid >= 2 / dual-TC path)
    x_big = jax.random.normal(xkey2, (48, STATE_SIZE), dtype=jnp.float32)
    q_big = jax.block_until_ready(qnetwork_forward(x_big, params))
    q_big_ref = qnetwork_forward_ref(x_big, params)
    assert q_big.shape == (48, ACTION_SIZE)
    assert jnp.allclose(q_big, q_big_ref, atol=5e-3, rtol=5e-3), \
        "large-batch mismatch vs JAX reference"

    print("KERNEL_OK")
</pallas_src>

<mosaic_0001>
module attributes {stable_mosaic.version = 11 : i64} {
  func.func @mlp_kernel(%arg0: i32, %arg1: memref<8x8xf32, #tpu.memory_space<vmem>>, %arg2: memref<8x256xbf16, #tpu.memory_space<vmem>>, %arg3: memref<6x256x256xbf16, #tpu.memory_space<vmem>>, %arg4: memref<7x256xf32, #tpu.memory_space<vmem>>, %arg5: memref<256x128xbf16, #tpu.memory_space<vmem>>, %arg6: memref<1x128xf32, #tpu.memory_space<vmem>>, %arg7: memref<8x128xf32, #tpu.memory_space<vmem>>) attributes {dimension_semantics = [#tpu.dimension_semantics<parallel>], iteration_bounds = array<i64: 1>, scalar_prefetch = 0 : i64, scratch_operands = 0 : i64, tpu.core_type = #tpu.core_type<tc>, window_params = [{transform_indices = @transform_0, window_bounds = array<i64: 8, 8>}, {pipeline_mode = #tpu.pipeline_mode<synchronous>, transform_indices = @transform_1, window_bounds = array<i64: 8, 256>}, {pipeline_mode = #tpu.pipeline_mode<synchronous>, transform_indices = @transform_2, window_bounds = array<i64: 6, 256, 256>}, {pipeline_mode = #tpu.pipeline_mode<synchronous>, transform_indices = @transform_3, window_bounds = array<i64: 7, 256>}, {pipeline_mode = #tpu.pipeline_mode<synchronous>, transform_indices = @transform_4, window_bounds = array<i64: 256, 128>}, {pipeline_mode = #tpu.pipeline_mode<synchronous>, transform_indices = @transform_5, window_bounds = array<i64: 1, 128>}, {transform_indices = @transform_6, window_bounds = array<i64: 8, 128>}]} {
    %c0 = arith.constant 0 : index
    %c0_0 = arith.constant 0 : index
    %0 = vector.load %arg4[%c0, %c0_0] : memref<7x256xf32, #tpu.memory_space<vmem>>, vector<7x256xf32>
    %c0_1 = arith.constant 0 : index
    %c0_2 = arith.constant 0 : index
    %1 = vector.load %arg1[%c0_1, %c0_2] : memref<8x8xf32, #tpu.memory_space<vmem>>, vector<8x8xf32>
    %2 = arith.truncf %1 : vector<8x8xf32> to vector<8x8xbf16>
    %c0_3 = arith.constant 0 : index
    %c0_4 = arith.constant 0 : index
    %3 = vector.load %arg2[%c0_3, %c0_4] : memref<8x256xbf16, #tpu.memory_space<vmem>>, vector<8x256xbf16>
    %cst = arith.constant dense<0.000000e+00> : vector<8x256xf32>
    %4 = tpu.matmul %2, %3, %cst {dimension_numbers = #tpu.dot_dimension_numbers<[1], [0], [0], [1], [0, 0, 1, 1], [], []>} : vector<8x8xbf16>, vector<8x256xbf16>, vector<8x256xf32> -> vector<8x256xf32>
    %5 = vector.extract_strided_slice %0 {offsets = [0, 0], sizes = [1, 256], strides = [1, 1]} : vector<7x256xf32> to vector<1x256xf32>
    %6 = vector.broadcast %5 : vector<1x256xf32> to vector<8x256xf32>
    %7 = arith.addf %4, %6 : vector<8x256xf32>
    %cst_5 = arith.constant 0.000000e+00 : f32
    %8 = vector.broadcast %cst_5 : f32 to vector<8x256xf32>
    %9 = arith.maximumf %7, %8 : vector<8x256xf32>
    %10 = arith.truncf %9 : vector<8x256xf32> to vector<8x256xbf16>
    %c0_6 = arith.constant 0 : index
    %c0_7 = arith.constant 0 : index
    %c0_8 = arith.constant 0 : index
    %11 = vector.load %arg3[%c0_6, %c0_7, %c0_8] : memref<6x256x256xbf16, #tpu.memory_space<vmem>>, vector<1x256x256xbf16>
    %12 = vector.shape_cast %11 : vector<1x256x256xbf16> to vector<256x256xbf16>
    %cst_9 = arith.constant dense<0.000000e+00> : vector<8x256xf32>
    %13 = tpu.matmul %10, %12, %cst_9 {dimension_numbers = #tpu.dot_dimension_numbers<[1], [0], [0], [1], [0, 0, 1, 1], [], []>} : vector<8x256xbf16>, vector<256x256xbf16>, vector<8x256xf32> -> vector<8x256xf32>
    %14 = vector.extract_strided_slice %0 {offsets = [1, 0], sizes = [1, 256], strides = [1, 1]} : vector<7x256xf32> to vector<1x256xf32>
    %15 = vector.broadcast %14 : vector<1x256xf32> to vector<8x256xf32>
    %16 = arith.addf %13, %15 : vector<8x256xf32>
    %cst_10 = arith.constant 0.000000e+00 : f32
    %17 = vector.broadcast %cst_10 : f32 to vector<8x256xf32>
    %18 = arith.maximumf %16, %17 : vector<8x256xf32>
    %19 = arith.truncf %18 : vector<8x256xf32> to vector<8x256xbf16>
    %c1 = arith.constant 1 : index
    %c0_11 = arith.constant 0 : index
    %c0_12 = arith.constant 0 : index
    %20 = vector.load %arg3[%c1, %c0_11, %c0_12] : memref<6x256x256xbf16, #tpu.memory_space<vmem>>, vector<1x256x256xbf16>
    %21 = vector.shape_cast %20 : vector<1x256x256xbf16> to vector<256x256xbf16>
    %cst_13 = arith.constant dense<0.000000e+00> : vector<8x256xf32>
    %22 = tpu.matmul %19, %21, %cst_13 {dimension_numbers = #tpu.dot_dimension_numbers<[1], [0], [0], [1], [0, 0, 1, 1], [], []>} : vector<8x256xbf16>, vector<256x256xbf16>, vector<8x256xf32> -> vector<8x256xf32>
    %23 = vector.extract_strided_slice %0 {offsets = [2, 0], sizes = [1, 256], strides = [1, 1]} : vector<7x256xf32> to vector<1x256xf32>
    %24 = vector.broadcast %23 : vector<1x256xf32> to vector<8x256xf32>
    %25 = arith.addf %22, %24 : vector<8x256xf32>
    %cst_14 = arith.constant 0.000000e+00 : f32
    %26 = vector.broadcast %cst_14 : f32 to vector<8x256xf32>
    %27 = arith.maximumf %25, %26 : vector<8x256xf32>
    %28 = arith.truncf %27 : vector<8x256xf32> to vector<8x256xbf16>
    %c2 = arith.constant 2 : index
    %c0_15 = arith.constant 0 : index
    %c0_16 = arith.constant 0 : index
    %29 = vector.load %arg3[%c2, %c0_15, %c0_16] : memref<6x256x256xbf16, #tpu.memory_space<vmem>>, vector<1x256x256xbf16>
    %30 = vector.shape_cast %29 : vector<1x256x256xbf16> to vector<256x256xbf16>
    %cst_17 = arith.constant dense<0.000000e+00> : vector<8x256xf32>
    %31 = tpu.matmul %28, %30, %cst_17 {dimension_numbers = #tpu.dot_dimension_numbers<[1], [0], [0], [1], [0, 0, 1, 1], [], []>} : vector<8x256xbf16>, vector<256x256xbf16>, vector<8x256xf32> -> vector<8x256xf32>
    %32 = vector.extract_strided_slice %0 {offsets = [3, 0], sizes = [1, 256], strides = [1, 1]} : vector<7x256xf32> to vector<1x256xf32>
    %33 = vector.broadcast %32 : vector<1x256xf32> to vector<8x256xf32>
    %34 = arith.addf %31, %33 : vector<8x256xf32>
    %cst_18 = arith.constant 0.000000e+00 : f32
    %35 = vector.broadcast %cst_18 : f32 to vector<8x256xf32>
    %36 = arith.maximumf %34, %35 : vector<8x256xf32>
    %37 = arith.truncf %36 : vector<8x256xf32> to vector<8x256xbf16>
    %c3 = arith.constant 3 : index
    %c0_19 = arith.constant 0 : index
    %c0_20 = arith.constant 0 : index
    %38 = vector.load %arg3[%c3, %c0_19, %c0_20] : memref<6x256x256xbf16, #tpu.memory_space<vmem>>, vector<1x256x256xbf16>
    %39 = vector.shape_cast %38 : vector<1x256x256xbf16> to vector<256x256xbf16>
    %cst_21 = arith.constant dense<0.000000e+00> : vector<8x256xf32>
    %40 = tpu.matmul %37, %39, %cst_21 {dimension_numbers = #tpu.dot_dimension_numbers<[1], [0], [0], [1], [0, 0, 1, 1], [], []>} : vector<8x256xbf16>, vector<256x256xbf16>, vector<8x256xf32> -> vector<8x256xf32>
    %41 = vector.extract_strided_slice %0 {offsets = [4, 0], sizes = [1, 256], strides = [1, 1]} : vector<7x256xf32> to vector<1x256xf32>
    %42 = vector.broadcast %41 : vector<1x256xf32> to vector<8x256xf32>
    %43 = arith.addf %40, %42 : vector<8x256xf32>
    %cst_22 = arith.constant 0.000000e+00 : f32
    %44 = vector.broadcast %cst_22 : f32 to vector<8x256xf32>
    %45 = arith.maximumf %43, %44 : vector<8x256xf32>
    %46 = arith.truncf %45 : vector<8x256xf32> to vector<8x256xbf16>
    %c4 = arith.constant 4 : index
    %c0_23 = arith.constant 0 : index
    %c0_24 = arith.constant 0 : index
    %47 = vector.load %arg3[%c4, %c0_23, %c0_24] : memref<6x256x256xbf16, #tpu.memory_space<vmem>>, vector<1x256x256xbf16>
    %48 = vector.shape_cast %47 : vector<1x256x256xbf16> to vector<256x256xbf16>
    %cst_25 = arith.constant dense<0.000000e+00> : vector<8x256xf32>
    %49 = tpu.matmul %46, %48, %cst_25 {dimension_numbers = #tpu.dot_dimension_numbers<[1], [0], [0], [1], [0, 0, 1, 1], [], []>} : vector<8x256xbf16>, vector<256x256xbf16>, vector<8x256xf32> -> vector<8x256xf32>
    %50 = vector.extract_strided_slice %0 {offsets = [5, 0], sizes = [1, 256], strides = [1, 1]} : vector<7x256xf32> to vector<1x256xf32>
    %51 = vector.broadcast %50 : vector<1x256xf32> to vector<8x256xf32>
    %52 = arith.addf %49, %51 : vector<8x256xf32>
    %cst_26 = arith.constant 0.000000e+00 : f32
    %53 = vector.broadcast %cst_26 : f32 to vector<8x256xf32>
    %54 = arith.maximumf %52, %53 : vector<8x256xf32>
    %55 = arith.truncf %54 : vector<8x256xf32> to vector<8x256xbf16>
    %c5 = arith.constant 5 : index
    %c0_27 = arith.constant 0 : index
    %c0_28 = arith.constant 0 : index
    %56 = vector.load %arg3[%c5, %c0_27, %c0_28] : memref<6x256x256xbf16, #tpu.memory_space<vmem>>, vector<1x256x256xbf16>
    %57 = vector.shape_cast %56 : vector<1x256x256xbf16> to vector<256x256xbf16>
    %cst_29 = arith.constant dense<0.000000e+00> : vector<8x256xf32>
    %58 = tpu.matmul %55, %57, %cst_29 {dimension_numbers = #tpu.dot_dimension_numbers<[1], [0], [0], [1], [0, 0, 1, 1], [], []>} : vector<8x256xbf16>, vector<256x256xbf16>, vector<8x256xf32> -> vector<8x256xf32>
    %59 = vector.extract_strided_slice %0 {offsets = [6, 0], sizes = [1, 256], strides = [1, 1]} : vector<7x256xf32> to vector<1x256xf32>
    %60 = vector.broadcast %59 : vector<1x256xf32> to vector<8x256xf32>
    %61 = arith.addf %58, %60 : vector<8x256xf32>
    %cst_30 = arith.constant 0.000000e+00 : f32
    %62 = vector.broadcast %cst_30 : f32 to vector<8x256xf32>
    %63 = arith.maximumf %61, %62 : vector<8x256xf32>
    %64 = arith.truncf %63 : vector<8x256xf32> to vector<8x256xbf16>
    %c0_31 = arith.constant 0 : index
    %c0_32 = arith.constant 0 : index
    %65 = vector.load %arg5[%c0_31, %c0_32] : memref<256x128xbf16, #tpu.memory_space<vmem>>, vector<256x128xbf16>
    %cst_33 = arith.constant dense<0.000000e+00> : vector<8x128xf32>
    %66 = tpu.matmul %64, %65, %cst_33 {dimension_numbers = #tpu.dot_dimension_numbers<[1], [0], [0], [1], [0, 0, 1, 1], [], []>} : vector<8x256xbf16>, vector<256x128xbf16>, vector<8x128xf32> -> vector<8x128xf32>
    %c0_34 = arith.constant 0 : index
    %c0_35 = arith.constant 0 : index
    %67 = vector.load %arg6[%c0_34, %c0_35] : memref<1x128xf32, #tpu.memory_space<vmem>>, vector<1x128xf32>
    %68 = vector.broadcast %67 : vector<1x128xf32> to vector<8x128xf32>
    %69 = arith.addf %66, %68 : vector<8x128xf32>
    %c0_36 = arith.constant 0 : index
    %c0_37 = arith.constant 0 : index
    %70 = vector.load %arg7[%c0_36, %c0_37] : memref<8x128xf32, #tpu.memory_space<vmem>>, vector<8x128xf32>
    tpu.vector_store %arg7[%c0_36, %c0_37], %69 {strides = array<i32>} : memref<8x128xf32, #tpu.memory_space<vmem>>, vector<8x128xf32>,
    return
  }
  func.func @transform_0(%arg0: i32) -> (i32, i32) {
    %c0_i32 = arith.constant 0 : i32
    %c0_i32_0 = arith.constant 0 : i32
    return %arg0, %c0_i32 : i32, i32
  }
  func.func @transform_1(%arg0: i32) -> (i32, i32) {
    %c0_i32 = arith.constant 0 : i32
    %c0_i32_0 = arith.constant 0 : i32
    %c0_i32_1 = arith.constant 0 : i32
    return %c0_i32, %c0_i32_0 : i32, i32
  }
  func.func @transform_2(%arg0: i32) -> (i32, i32, i32) {
    %c0_i32 = arith.constant 0 : i32
    %c0_i32_0 = arith.constant 0 : i32
    %c0_i32_1 = arith.constant 0 : i32
    %c0_i32_2 = arith.constant 0 : i32
    return %c0_i32, %c0_i32_0, %c0_i32_1 : i32, i32, i32
  }
  func.func @transform_3(%arg0: i32) -> (i32, i32) {
    %c0_i32 = arith.constant 0 : i32
    %c0_i32_0 = arith.constant 0 : i32
    %c0_i32_1 = arith.constant 0 : i32
    return %c0_i32, %c0_i32_0 : i32, i32
  }
  func.func @transform_4(%arg0: i32) -> (i32, i32) {
    %c0_i32 = arith.constant 0 : i32
    %c0_i32_0 = arith.constant 0 : i32
    %c0_i32_1 = arith.constant 0 : i32
    return %c0_i32, %c0_i32_0 : i32, i32
  }
  func.func @transform_5(%arg0: i32) -> (i32, i32) {
    %c0_i32 = arith.constant 0 : i32
    %c0_i32_0 = arith.constant 0 : i32
    %c0_i32_1 = arith.constant 0 : i32
    return %c0_i32, %c0_i32_0 : i32, i32
  }
  func.func @transform_6(%arg0: i32) -> (i32, i32) {
    %c0_i32 = arith.constant 0 : i32
    %c0_i32_0 = arith.constant 0 : i32
    return %arg0, %c0_i32 : i32, i32
  }
}

</mosaic_0001>

<bundles_post_ra>
// kernel: tpu_custom_call.1
= control target key start
LH: loop header
LB: loop body
LE: loop exit
PB: predicated region body
PF: predicated region fallthrough
CT: control target
= control target key end

     0   :  { %11 = vsyncpa [#allocation3], 0  ;;  %s3132_s0 = inlined_call_operand.hbm [shape: f32[8,8], index: 0, kind: input, shape index: {}]   ;;  %s3133_s1 = inlined_call_operand.hbm [shape: bf16[8,256], index: 1, kind: input, shape index: {}]   ;;  %s3134_s2 = inlined_call_operand.hbm [shape: bf16[6,256,256], index: 2, kind: input, shape index: {}]   ;;  %s3135_s3 = inlined_call_operand.hbm [shape: f32[7,256], index: 3, kind: input, shape index: {}]   ;;  %s3136_s4 = inlined_call_operand.hbm [shape: bf16[256,128], index: 4, kind: input, shape index: {}]   ;;  %s3137_s5 = inlined_call_operand.vmem [shape: f32[1,128], index: 5, kind: input, shape index: {}]   ;;  %s3138_s6 = inlined_call_operand.hbm [shape: f32[8,128], index: 6, kind: output, shape index: {}]  }
   0x1   :  { %12 = vsyncpa [#allocation6], 0 }
   0x2   :  { %13 = vsyncpa [#allocation9], 0  ;;  %s31_s23 = sshll.u32 %s3133_s1, 4  ;;  %s32_s23 = int_to_ptr.hbm [resolvable:$true] %s31_s23 }
   0x3   :  { %14 = vsyncpa [#allocation4], 0  ;;  %s3040_s24 = smov [#allocation5]   ;;  %s55_s28 = sshll.u32 %s3135_s3, 4  ;;  %s56_s28 = int_to_ptr.hbm [resolvable:$true] %s55_s28 }
   0x4   :  { %s33_s25 = sshll.u32 %s3040_s24, 4  ;;  %s3041_s29 = smov [#allocation8]   ;;  %s34_s25 = int_to_ptr.vmem [resolvable:$true] %s33_s25 }
   0x5   :  { %36 = dma.hbm_to_vmem [thread:$0]  %s32_s23, 128, %s34_s25, [#allocation6]  }
   0x6   :  { %s57_s30 = sshll.u32 %s3041_s29, 4  ;;  %s20_s9 = sshll.u32 %s3132_s0, 4  ;;  %s58_s30 = int_to_ptr.vmem [resolvable:$true] %s57_s30  ;;  %s21_s9 = int_to_ptr.hbm [resolvable:$true] %s20_s9 }
   0x7   :  { %60 = dma.hbm_to_vmem [thread:$0]  %s56_s28, 256, %s58_s30, [#allocation9]  }
   0x8   :  { %s41_s11 = sshll.u32 %s3134_s2, 4  ;;  %s3042_s12 = smov [#allocation2]   ;;  %s42_s11 = int_to_ptr.hbm [resolvable:$true] %s41_s11 }
   0x9   :  { %s22_s13 = sshll.u32 %s3042_s12, 4  ;;  %s3043_s3 = smov [#allocation7]   ;;  %s23_s13 = int_to_ptr.vmem [resolvable:$true] %s22_s13 }
   0xa   :  { %25 = dma.hbm_to_vmem [thread:$0]  %s21_s9, 128, %s23_s13, [#allocation3]  }
   0xb   :  { %s43_s14 = sshll.u32 %s3043_s3, 4  ;;  %s3044_s15 = smov 128   ;;  %s44_s14 = int_to_ptr.vmem [resolvable:$true] %s43_s14 }
   0xc   :  { %s3045_s16 = smov 8   ;;  %s65_s18 = sshll.u32 %s3136_s4, 4  ;;  %s66_s18 = int_to_ptr.hbm [resolvable:$true] %s65_s18 }
   0xd   :  { %49 = dma.hbm_to_vmem [thread:$0]  %s42_s11, 24576, %s44_s14, [#allocation6], %s3044_s15, %s3044_s15, %s3045_s16  }
   0xe   :  { %s3046_s19 = smov [#allocation10]   ;;  %s3047_s2 = smov 64  }
   0xf   :  { %s67_s20 = sshll.u32 %s3046_s19, 4  ;;  %s3048_s21 = smov 4   ;;  %s68_s20 = int_to_ptr.vmem [resolvable:$true] %s67_s20 }
  0x10   :  { %73 = dma.hbm_to_vmem [thread:$0]  %s66_s18, 2048, %s68_s20, [#allocation9], %s3047_s2, %s3047_s2, %s3048_s21  }
  0x11   :  { %3032 = dma.done.wait [#allocation3], 128  }
  0x12   :  { %3033 = vsyncadd [#allocation3], 4294967168 }
  0x13   :  { %3034 = dma.done.wait [#allocation6], 24704  }
  0x14   :  { %3035 = vsyncadd [#allocation6], 4294942592 }
  0x15   :  { %3036 = dma.done.wait [#allocation9], 2304  }
  0x16   :  { %3037 = vsyncadd [#allocation9], 4294964992  ;;  %v101_v0 = vld [vmem:[#allocation5] sm:$0xff]  ;;  %vm113_vm0 = vcmask 1043456   ;;  %v99_v1 = vld [vmem:[#allocation2] sm:$0xff]  ;;  %vm109_vm1 = vcmask 64512  }
  0x17   :  { %v1893_v2 = vld [vmem:[#allocation7 + $0x70] sm:$0xf]  ;;  %v105_v3 = vunpack.c.l.b16 %v101_v0  ;;  %v106_v4 = vunpack.c.h.b16 %v101_v0  ;;  %v2682_v5 = vld [vmem:[#allocation7 + $0x74] sm:$0xf0]  ;;  %v2681_v10 = vld [vmem:[#allocation7 + $0x74] sm:$0xf]  ;;  %v100_v26 = vpack.c.bf16 %v99_v1, %v99_v1 }
  0x18   :  { %v1957_v6 = vld [vmem:[#allocation7 + $0xf0] sm:$0xf]  ;;  %v2698_v7 = vld [vmem:[#allocation7 + $0xf4] sm:$0xf0]  ;;  %v1894_v8 = vor.u32 %v2682_v5, %v1893_v2  ;;  %v1895_v11 = vld [vmem:[#allocation7 + $0x78] sm:$0xf0] }
  0x19   :  { %v1958_v9 = vor.u32 %v2698_v7, %v1957_v6  ;;  %v2697_v12 = vld [vmem:[#allocation7 + $0xf4] sm:$0xf]  ;;  %v107_v13 = vpack.c.b16 %v105_v3, %v105_v3  ;;  %v108_v14 = vpack.c.b16 %v106_v4, %v106_v4  ;;  %v1898_v15 = vor.u32 %v2681_v10, %v1895_v11  ;;  %v1959_v16 = vld [vmem:[#allocation7 + $0xf8] sm:$0xf0]  ;;  %v1885_v17 = vld [vmem:[#allocation7 + $0x60] sm:$0xf] }
  0x1a   :  { %v2680_v18 = vld [vmem:[#allocation7 + $0x64] sm:$0xf0]  ;;  %344 = vmatpush.bf16.msra.mxu2 %v1894_v8  ;;  %v1962_v19 = vor.u32 %v2697_v12, %v1959_v16  ;;  %v1949_v21 = vld [vmem:[#allocation7 + $0xe0] sm:$0xf]  ;;  %v2679_v23 = vld [vmem:[#allocation7 + $0x64] sm:$0xf] }
  0x1b   :  { %357 = vmatpush.bf16.msra.mxu3 %v1958_v9  ;;  %v1886_v20 = vor.u32 %v2680_v18, %v1885_v17  ;;  %v2696_v22 = vld [vmem:[#allocation7 + $0xe4] sm:$0xf0]  ;;  %v115_v24 = vsel %vm113_vm0, %v107_v13, 0  ;;  %v118_v25 = vsel %vm113_vm0, %v108_v14, 0  ;;  %v1887_v28 = vld [vmem:[#allocation7 + $0x68] sm:$0xf0] }
  0x1c   :  { %v1950_v27 = vor.u32 %v2696_v22, %v1949_v21  ;;  %v2695_v29 = vld [vmem:[#allocation7 + $0xe4] sm:$0xf]  ;;  %127 = vmatpush.bf16.msra.mxu0 %v115_v24  ;;  %140 = vmatpush.bf16.msra.mxu1 %v118_v25  ;;  %v1951_v30 = vld [vmem:[#allocation7 + $0xe8] sm:$0xf0]  ;;  %v1877_v31 = vld [vmem:[#allocation7 + $0x50] sm:$0xf]  ;;  %v1890_v33 = vor.u32 %v2679_v23, %v1887_v28 }
  0x1d   :  { %v2678_v32 = vld [vmem:[#allocation7 + $0x54] sm:$0xf0]  ;;  %v1954_v34 = vor.u32 %v2695_v29, %v1951_v30  ;;  %v1941_v35 = vld [vmem:[#allocation7 + $0xd0] sm:$0xf]  ;;  %v2677_v37 = vld [vmem:[#allocation7 + $0x54] sm:$0xf] }
  0x1e   :  { %v2694_v36 = vld [vmem:[#allocation7 + $0xd4] sm:$0xf0]  ;;  %345 = vmatpush.bf16.msra.mxu2 %v1886_v20  ;;  %v1878_v38 = vor.u32 %v2678_v32, %v1877_v31  ;;  %v1879_v40 = vld [vmem:[#allocation7 + $0x58] sm:$0xf0]  ;;  %v2693_v41 = vld [vmem:[#allocation7 + $0xd4] sm:$0xf] }
  0x1f   :  { %358 = vmatpush.bf16.msra.mxu3 %v1950_v27  ;;  %v1942_v39 = vor.u32 %v2694_v36, %v1941_v35  ;;  %v1943_v42 = vld [vmem:[#allocation7 + $0xd8] sm:$0xf0]  ;;  %1833 = vmatmul.msk.bf16.vlgmr.msra.gmra.mxu0 %vm109_vm1, %v100_v26  ;;  %v1869_v43 = vld [vmem:[#allocation7 + $0x40] sm:$0xf]  ;;  %v2676_v44 = vld [vmem:[#allocation7 + $0x44] sm:$0xf0]  ;;  %v1882_v47 = vor.u32 %v2677_v37, %v1879_v40 }
  0x20   :  { %370 = vmatpush.bf16.msrb.mxu0 %v1898_v15  ;;  %383 = vmatpush.bf16.msrb.mxu1 %v1962_v19  ;;  %v1933_v45 = vld [vmem:[#allocation7 + $0xc0] sm:$0xf]  ;;  %v2692_v46 = vld [vmem:[#allocation7 + $0xc4] sm:$0xf0]  ;;  %v1946_v48 = vor.u32 %v2693_v41, %v1943_v42  ;;  %v2675_v49 = vld [vmem:[#allocation7 + $0x44] sm:$0xf]  ;;  %v1870_v51 = vor.u32 %v2676_v44, %v1869_v43 }
  0x21   :  { %1834 = vmatmul.msk.bf16.vlgmr.msra.gmra.mxu1 %vm109_vm1, %v100_v26  ;;  %v1871_v50 = vld [vmem:[#allocation7 + $0x48] sm:$0xf0]  ;;  %v1934_v52 = vor.u32 %v2692_v46, %v1933_v45  ;;  %v2691_v53 = vld [vmem:[#allocation7 + $0xc4] sm:$0xf]  ;;  %v1861_v55 = vld [vmem:[#allocation7 + $0x30] sm:$0xf] }
  0x22   :  { %346 = vmatpush.bf16.msra.mxu2 %v1878_v38  ;;  %v1935_v54 = vld [vmem:[#allocation7 + $0xc8] sm:$0xf0]  ;;  %v2674_v56 = vld [vmem:[#allocation7 + $0x34] sm:$0xf0]  ;;  %v1925_v57 = vld [vmem:[#allocation7 + $0xb0] sm:$0xf]  ;;  %v1874_v59 = vor.u32 %v2675_v49, %v1871_v50 }
  0x23   :  { %359 = vmatpush.bf16.msra.mxu3 %v1942_v39  ;;  %v2690_v58 = vld [vmem:[#allocation7 + $0xb4] sm:$0xf0]  ;;  %v1938_v60 = vor.u32 %v2691_v53, %v1935_v54  ;;  %v2673_v61 = vld [vmem:[#allocation7 + $0x34] sm:$0xf]  ;;  %v1863_v62 = vld [vmem:[#allocation7 + $0x38] sm:$0xf0]  ;;  %v1862_v0 = vor.u32 %v2674_v56, %v1861_v55 }
  0x24   :  { %371 = vmatpush.bf16.msrb.mxu0 %v1890_v33  ;;  %384 = vmatpush.bf16.msrb.mxu1 %v1954_v34  ;;  %v2689_v63 = vld [vmem:[#allocation7 + $0xb4] sm:$0xf]  ;;  %v1926_v1 = vor.u32 %v2690_v58, %v1925_v57  ;;  %v1927_v2 = vld [vmem:[#allocation7 + $0xb8] sm:$0xf0]  ;;  %v1853_v3 = vld [vmem:[#allocation7 + $0x20] sm:$0xf]  ;;  %v1866_v7 = vor.u32 %v2673_v61, %v1863_v62 }
  0x25   :  { %v2672_v4 = vld [vmem:[#allocation7 + $0x24] sm:$0xf0]  ;;  %v1917_v5 = vld [vmem:[#allocation7 + $0xa0] sm:$0xf]  ;;  %v1930_v8 = vor.u32 %v2689_v63, %v1927_v2  ;;  %v2671_v9 = vld [vmem:[#allocation7 + $0x24] sm:$0xf] }
  0x26   :  { %347 = vmatpush.bf16.msra.mxu2 %v1870_v51  ;;  %v2688_v6 = vld [vmem:[#allocation7 + $0xa4] sm:$0xf0]  ;;  %v1854_v10 = vor.u32 %v2672_v4, %v1853_v3  ;;  %v1855_v12 = vld [vmem:[#allocation7 + $0x28] sm:$0xf0]  ;;  %v2687_v13 = vld [vmem:[#allocation7 + $0xa4] sm:$0xf] }
  0x27   :  { %360 = vmatpush.bf16.msra.mxu3 %v1934_v52  ;;  %v1918_v11 = vor.u32 %v2688_v6, %v1917_v5  ;;  %v1919_v14 = vld [vmem:[#allocation7 + $0xa8] sm:$0xf0]  ;;  %v1858_v15 = vor.u32 %v2671_v9, %v1855_v12  ;;  %v1845_v17 = vld [vmem:[#allocation7 + $0x10] sm:$0xf]  ;;  %v2670_v18 = vld [vmem:[#allocation7 + $0x14] sm:$0xf0] }
  0x28   :  { %372 = vmatpush.bf16.msrb.mxu0 %v1882_v47  ;;  %385 = vmatpush.bf16.msrb.mxu1 %v1946_v48  ;;  %v1922_v16 = vor.u32 %v2687_v13, %v1919_v14  ;;  %v1909_v19 = vld [vmem:[#allocation7 + $0x90] sm:$0xf]  ;;  %v1846_v20 = vor.u32 %v2670_v18, %v1845_v17  ;;  %v2686_v21 = vld [vmem:[#allocation7 + $0x94] sm:$0xf0]  ;;  %v2669_v22 = vld [vmem:[#allocation7 + $0x14] sm:$0xf] }
  0x29   :  { %v1910_v23 = vor.u32 %v2686_v21, %v1909_v19  ;;  %v1847_v24 = vld [vmem:[#allocation7 + $0x18] sm:$0xf0]  ;;  %v2685_v25 = vld [vmem:[#allocation7 + $0x94] sm:$0xf]  ;;  %v1837_v29 = vld [vmem:[#allocation7] sm:$0xf] }
  0x2a   :  { %348 = vmatpush.bf16.msra.mxu2 %v1862_v0  ;;  %v1850_v26 = vor.u32 %v2669_v22, %v1847_v24  ;;  %v1911_v27 = vld [vmem:[#allocation7 + $0x98] sm:$0xf0]  ;;  %v2668_v30 = vld [vmem:[#allocation7 + $0x4] sm:$0xf0]  ;;  %v1901_v31 = vld [vmem:[#allocation7 + $0x80] sm:$0xf] }
  0x2b   :  { %361 = vmatpush.bf16.msra.mxu3 %v1926_v1  ;;  %v1914_v28 = vor.u32 %v2685_v25, %v1911_v27  ;;  %v1838_v32 = vor.u32 %v2668_v30, %v1837_v29  ;;  %v2684_v33 = vld [vmem:[#allocation7 + $0x84] sm:$0xf0]  ;;  %v2667_v34 = vld [vmem:[#allocation7 + $0x4] sm:$0xf]  ;;  %v1839_v35 = vld [vmem:[#allocation7 + $0x8] sm:$0xf0] }
  0x2c   :  { %373 = vmatpush.bf16.msrb.mxu0 %v1874_v59  ;;  %386 = vmatpush.bf16.msrb.mxu1 %v1938_v60  ;;  %v1902_v36 = vor.u32 %v2684_v33, %v1901_v31  ;;  %v1842_v37 = vor.u32 %v2667_v34, %v1839_v35  ;;  %v2683_v38 = vld [vmem:[#allocation7 + $0x84] sm:$0xf]  ;;  %v1903_v39 = vld [vmem:[#allocation7 + $0x88] sm:$0xf0]  ;;  %v2085_v41 = vld [vmem:[#allocation7 + $0x1f0] sm:$0xf] }
  0x2d   :  { %v1906_v40 = vor.u32 %v2683_v38, %v1903_v39  ;;  %v2730_v42 = vld [vmem:[#allocation7 + $0x1f4] sm:$0xf0]  ;;  %v2729_v43 = vld [vmem:[#allocation7 + $0x1f4] sm:$0xf]  ;;  %v2087_v45 = vld [vmem:[#allocation7 + $0x1f8] sm:$0xf0] }
  0x2e   :  { %349 = vmatpush.bf16.msra.mxu2 %v1854_v10  ;;  %v2086_v44 = vor.u32 %v2730_v42, %v2085_v41  ;;  %v2077_v46 = vld [vmem:[#allocation7 + $0x1e0] sm:$0xf]  ;;  %v2728_v47 = vld [vmem:[#allocation7 + $0x1e4] sm:$0xf0]  ;;  %v2090_v48 = vor.u32 %v2729_v43, %v2087_v45  ;;  %v2727_v49 = vld [vmem:[#allocation7 + $0x1e4] sm:$0xf] }
  0x2f   :  { %362 = vmatpush.bf16.msra.mxu3 %v1918_v11  ;;  %v2079_v50 = vld [vmem:[#allocation7 + $0x1e8] sm:$0xf0]  ;;  %v2021_v51 = vld [vmem:[#allocation7 + $0x170] sm:$0xf]  ;;  %v2078_v52 = vor.u32 %v2728_v47, %v2077_v46  ;;  %v2714_v53 = vld [vmem:[#allocation7 + $0x174] sm:$0xf0] }
  0x30   :  { %374 = vmatpush.bf16.msrb.mxu0 %v1866_v7  ;;  %387 = vmatpush.bf16.msrb.mxu1 %v1930_v8  ;;  %v2713_v54 = vld [vmem:[#allocation7 + $0x174] sm:$0xf]  ;;  %v2023_v55 = vld [vmem:[#allocation7 + $0x178] sm:$0xf0]  ;;  %v2082_v56 = vor.u32 %v2727_v49, %v2079_v50  ;;  %v2022_v57 = vor.u32 %v2714_v53, %v2021_v51  ;;  %v2069_v59 = vld [vmem:[#allocation7 + $0x1d0] sm:$0xf] }
  0x31   :  { %v2026_v58 = vor.u32 %v2713_v54, %v2023_v55  ;;  %v2726_v60 = vld [vmem:[#allocation7 + $0x1d4] sm:$0xf0]  ;;  %v2725_v61 = vld [vmem:[#allocation7 + $0x1d4] sm:$0xf]  ;;  %v2071_v62 = vld [vmem:[#allocation7 + $0x1d8] sm:$0xf0] }
  0x32   :  { %350 = vmatpush.bf16.msra.mxu2 %v1846_v20  ;;  %v2013_v63 = vld [vmem:[#allocation7 + $0x160] sm:$0xf]  ;;  %v2712_v0 = vld [vmem:[#allocation7 + $0x164] sm:$0xf0]  ;;  %v2711_v2 = vld [vmem:[#allocation7 + $0x164] sm:$0xf]  ;;  %v2070_v4 = vor.u32 %v2726_v60, %v2069_v59  ;;  %v2074_v8 = vor.u32 %v2725_v61, %v2071_v62 }
  0x33   :  { %363 = vmatpush.bf16.msra.mxu3 %v1910_v23  ;;  %v2014_v1 = vor.u32 %v2712_v0, %v2013_v63  ;;  %v2015_v3 = vld [vmem:[#allocation7 + $0x168] sm:$0xf0]  ;;  %v2061_v6 = vld [vmem:[#allocation7 + $0x1c0] sm:$0xf]  ;;  %v2724_v7 = vld [vmem:[#allocation7 + $0x1c4] sm:$0xf0] }
  0x34   :  { %375 = vmatpush.bf16.msrb.mxu0 %v1858_v15  ;;  %388 = vmatpush.bf16.msrb.mxu1 %v1922_v16  ;;  %v2018_v5 = vor.u32 %v2711_v2, %v2015_v3  ;;  %v2005_v9 = vld [vmem:[#allocation7 + $0x150] sm:$0xf]  ;;  %v2710_v10 = vld [vmem:[#allocation7 + $0x154] sm:$0xf0]  ;;  %v2709_v11 = vld [vmem:[#allocation7 + $0x154] sm:$0xf]  ;;  %v2062_v18 = vor.u32 %v2724_v7, %v2061_v6 }
  0x35   :  { %v2723_v12 = vld [vmem:[#allocation7 + $0x1c4] sm:$0xf]  ;;  %v2063_v13 = vld [vmem:[#allocation7 + $0x1c8] sm:$0xf0]  ;;  %v2007_v14 = vld [vmem:[#allocation7 + $0x158] sm:$0xf0]  ;;  %v2006_v15 = vor.u32 %v2710_v10, %v2005_v9 }
  0x36   :  { %351 = vmatpush.bf16.msra.mxu2 %v1838_v32  ;;  %v2010_v16 = vor.u32 %v2709_v11, %v2007_v14  ;;  %v1997_v17 = vld [vmem:[#allocation7 + $0x140] sm:$0xf]  ;;  %v2708_v19 = vld [vmem:[#allocation7 + $0x144] sm:$0xf0]  ;;  %v2707_v20 = vld [vmem:[#allocation7 + $0x144] sm:$0xf]  ;;  %v2066_v22 = vor.u32 %v2723_v12, %v2063_v13 }
  0x37   :  { %364 = vmatpush.bf16.msra.mxu3 %v1902_v36  ;;  %v1999_v21 = vld [vmem:[#allocation7 + $0x148] sm:$0xf0]  ;;  %v2053_v23 = vld [vmem:[#allocation7 + $0x1b0] sm:$0xf]  ;;  %v2722_v24 = vld [vmem:[#allocation7 + $0x1b4] sm:$0xf0]  ;;  %v1998_v27 = vor.u32 %v2708_v19, %v1997_v17 }
  0x38   :  { %376 = vmatpush.bf16.msrb.mxu0 %v1850_v26  ;;  %389 = vmatpush.bf16.msrb.mxu1 %v1914_v28  ;;  %v2721_v25 = vld [vmem:[#allocation7 + $0x1b4] sm:$0xf]  ;;  %v2055_v26 = vld [vmem:[#allocation7 + $0x1b8] sm:$0xf0]  ;;  %v2002_v28 = vor.u32 %v2707_v20, %v1999_v21  ;;  %v2054_v29 = vor.u32 %v2722_v24, %v2053_v23  ;;  %v2045_v31 = vld [vmem:[#allocation7 + $0x1a0] sm:$0xf] }
  0x39   :  { %v2058_v30 = vor.u32 %v2721_v25, %v2055_v26  ;;  %v2720_v32 = vld [vmem:[#allocation7 + $0x1a4] sm:$0xf0]  ;;  %v2719_v33 = vld [vmem:[#allocation7 + $0x1a4] sm:$0xf]  ;;  %v2047_v34 = vld [vmem:[#allocation7 + $0x1a8] sm:$0xf0] }
  0x3a   :  { %595 = vmatpush.bf16.msrb.mxu2 %v2022_v57  ;;  %v3104_v35 = vld [vmem:[#allocation8] sm:$0x7f]  ;;  %v3106_v36 = vld [vmem:[#allocation8 + $0x8] sm:$0x7f]  ;;  %v2050_v38 = vor.u32 %v2719_v33, %v2047_v34  ;;  %v1989_v51 = vld [vmem:[#allocation7 + $0x130] sm:$0xf] }
  0x3b   :  { %608 = vmatpush.bf16.msrb.mxu3 %v2086_v44  ;;  %v102_v39 = vperm.slane %v3104_v35, 0  ;;  %v2705_v53 = vld [vmem:[#allocation7 + $0x134] sm:$0xf]  ;;  %v1991_v55 = vld [vmem:[#allocation7 + $0x138] sm:$0xf0]  ;;  %s3049_s23 = smov [#allocation11]  }
  0x3c   :  { %377 = vmatpush.bf16.msrb.mxu0 %v1842_v37  ;;  %390 = vmatpush.bf16.msrb.mxu1 %v1906_v40  ;;  %v2046_v37 = vor.u32 %v2720_v32, %v2045_v31  ;;  %v103_v40 = vperm.slane %v3106_v36, 0  ;;  %v2037_v57 = vld [vmem:[#allocation7 + $0x190] sm:$0xf]  ;;  %v2717_v59 = vld [vmem:[#allocation7 + $0x194] sm:$0xf]  ;;  %s1819_s24 = sshll.u32 %s3049_s23, 4  ;;  %s1820_s24 = int_to_ptr.vmem [resolvable:$true] %s1819_s24 }
  0x3d   :  { %v2039_v61 = vld [vmem:[#allocation7 + $0x198] sm:$0xf0]  ;;  %v1981_v63 = vld [vmem:[#allocation7 + $0x120] sm:$0xf]  ;;  %v2704_v0 = vld [vmem:[#allocation7 + $0x124] sm:$0xf0] }
  0x3e   :  { %596 = vmatpush.bf16.msrb.mxu2 %v2014_v1  ;;  %v2042_v62 = vor.u32 %v2717_v59, %v2039_v61  ;;  %v2703_v1 = vld [vmem:[#allocation7 + $0x124] sm:$0xf]  ;;  %v1982_v2 = vor.u32 %v2704_v0, %v1981_v63  ;;  %v1983_v3 = vld [vmem:[#allocation7 + $0x128] sm:$0xf0]  ;;  %v2716_v6 = vld [vmem:[#allocation7 + $0x184] sm:$0xf0] }
  0x3f   :  { %609 = vmatpush.bf16.msrb.mxu3 %v2078_v52  ;;  %v2706_v52 = vld [vmem:[#allocation7 + $0x134] sm:$0xf0]  ;;  %v2715_v7 = vld [vmem:[#allocation7 + $0x184] sm:$0xf]  ;;  %v2031_v9 = vld [vmem:[#allocation7 + $0x188] sm:$0xf0] }
  0x40   :  { %634 = vmatpush.bf16.msra.mxu1 %v2090_v48  ;;  %621 = vmatpush.bf16.msra.mxu0 %v2026_v58  ;;  %v1990_v54 = vor.u32 %v2706_v52, %v1989_v51  ;;  %v2718_v58 = vld [vmem:[#allocation7 + $0x194] sm:$0xf0]  ;;  %v2034_v10 = vor.u32 %v2715_v7, %v2031_v9  ;;  %v1973_v11 = vld [vmem:[#allocation7 + $0x110] sm:$0xf]  ;;  %v2701_v14 = vld [vmem:[#allocation7 + $0x114] sm:$0xf] }
  0x41   :  { %v2038_v60 = vor.u32 %v2718_v58, %v2037_v57  ;;  %v2702_v12 = vld [vmem:[#allocation7 + $0x114] sm:$0xf0]  ;;  %v1965_v17 = vld [vmem:[#allocation7 + $0x100] sm:$0xf]  ;;  %v2699_v19 = vld [vmem:[#allocation7 + $0x104] sm:$0xf] }
  0x42   :  { %597 = vmatpush.bf16.msrb.mxu2 %v2006_v15  ;;  %v1974_v13 = vor.u32 %v2702_v12, %v1973_v11  ;;  %v1975_v15 = vld [vmem:[#allocation7 + $0x118] sm:$0xf0]  ;;  %v1967_v21 = vld [vmem:[#allocation7 + $0x108] sm:$0xf0]  ;;  %v2213_v23 = vld [vmem:[#allocation7 + $0x2f0] sm:$0xf] }
  0x43   :  { %610 = vmatpush.bf16.msrb.mxu3 %v2070_v4  ;;  %v1986_v4 = vor.u32 %v2703_v1, %v1983_v3  ;;  %v2762_v24 = vld [vmem:[#allocation7 + $0x2f4] sm:$0xf0]  ;;  %v2761_v25 = vld [vmem:[#allocation7 + $0x2f4] sm:$0xf]  ;;  %v2759_v31 = vld [vmem:[#allocation7 + $0x2e4] sm:$0xf] }
  0x44   :  { %635 = vmatpush.bf16.msra.mxu1 %v2082_v56  ;;  %622 = vmatpush.bf16.msra.mxu0 %v2018_v5  ;;  %v1994_v56 = vor.u32 %v2705_v53, %v1991_v55  ;;  %v2029_v5 = vld [vmem:[#allocation7 + $0x180] sm:$0xf]  ;;  %v2214_v26 = vor.u32 %v2762_v24, %v2213_v23  ;;  %v2207_v32 = vld [vmem:[#allocation7 + $0x2e8] sm:$0xf0]  ;;  %v2149_v33 = vld [vmem:[#allocation7 + $0x270] sm:$0xf] }
  0x45   :  { %v2143_v51 = vld [vmem:[#allocation7 + $0x268] sm:$0xf0]  ;;  %v2756_v55 = vld [vmem:[#allocation7 + $0x2c4] sm:$0xf0]  ;;  %v2133_v57 = vld [vmem:[#allocation7 + $0x250] sm:$0xf] }
  0x46   :  { %598 = vmatpush.bf16.msrb.mxu2 %v1998_v27  ;;  %v2215_v27 = vld [vmem:[#allocation7 + $0x2f8] sm:$0xf0]  ;;  %v2742_v58 = vld [vmem:[#allocation7 + $0x254] sm:$0xf0]  ;;  %v2741_v59 = vld [vmem:[#allocation7 + $0x254] sm:$0xf] }
  0x47   :  { %611 = vmatpush.bf16.msrb.mxu3 %v2062_v18  ;;  %v2700_v18 = vld [vmem:[#allocation7 + $0x104] sm:$0xf0]  ;;  %v2191_v61 = vld [vmem:[#allocation7 + $0x2c8] sm:$0xf0]  ;;  %v2134_v63 = vor.u32 %v2742_v58, %v2133_v57  ;;  %v183_v3 = vperm.slane %v3106_v36, 1  ;;  %v182_v7 = vperm.slane %v3104_v35, 1 }
  0x48   :  { %636 = vmatpush.bf16.msra.mxu1 %v2074_v8  ;;  %623 = vmatpush.bf16.msra.mxu0 %v2010_v16  ;;  %v2030_v8 = vor.u32 %v2716_v6, %v2029_v5  ;;  %v1978_v16 = vor.u32 %v2701_v14, %v1975_v15  ;;  %v1966_v20 = vor.u32 %v2700_v18, %v1965_v17  ;;  %v2753_v23 = vld [vmem:[#allocation7 + $0x2b4] sm:$0xf]  ;;  %v2111_v57 = vld [vmem:[#allocation7 + $0x228] sm:$0xf0]  ;;  %s1821_s27 = sshll.u32 %s3138_s6, 4  ;;  %s1822_s27 = int_to_ptr.hbm [resolvable:$true] %s1821_s27 }
  0x4a   :  { %599 = vmatpush.bf16.msrb.mxu2 %v1990_v54  ;;  %v2189_v54 = vld [vmem:[#allocation7 + $0x2c0] sm:$0xf] }
  0x4b   :  { %612 = vmatpush.bf16.msrb.mxu3 %v2054_v29  ;;  %v2760_v29 = vld [vmem:[#allocation7 + $0x2e4] sm:$0xf0]  ;;  %v2190_v1 = vor.u32 %v2756_v55, %v2189_v54  ;;  %v2735_v55 = vld [vmem:[#allocation7 + $0x224] sm:$0xf] }
  0x4c   :  { %637 = vmatpush.bf16.msra.mxu1 %v2066_v22  ;;  %624 = vmatpush.bf16.msra.mxu0 %v2002_v28  ;;  %v1970_v22 = vor.u32 %v2699_v19, %v1967_v21  ;;  %v2205_v28 = vld [vmem:[#allocation7 + $0x2e0] sm:$0xf]  ;;  %v2181_v21 = vld [vmem:[#allocation7 + $0x2b0] sm:$0xf]  ;;  %v2736_v54 = vld [vmem:[#allocation7 + $0x224] sm:$0xf0]  ;;  %v2114_v58 = vor.u32 %v2735_v55, %v2111_v57 }
  0x4d   :  { %v2206_v34 = vor.u32 %v2760_v29, %v2205_v28  ;;  %v2740_v28 = vld [vmem:[#allocation7 + $0x244] sm:$0xf0]  ;;  %v2739_v29 = vld [vmem:[#allocation7 + $0x244] sm:$0xf] }
  0x4e   :  { %600 = vmatpush.bf16.msrb.mxu2 %v1982_v2 }
  0x4f   :  { %613 = vmatpush.bf16.msrb.mxu3 %v2046_v37  ;;  %v2746_v37 = vld [vmem:[#allocation7 + $0x274] sm:$0xf0] }
  0x50   :  { %638 = vmatpush.bf16.msra.mxu1 %v2058_v30  ;;  %625 = vmatpush.bf16.msra.mxu0 %v1994_v56  ;;  %v2218_v30 = vor.u32 %v2761_v25, %v2215_v27  ;;  %v2183_v25 = vld [vmem:[#allocation7 + $0x2b8] sm:$0xf0]  ;;  %v2125_v27 = vld [vmem:[#allocation7 + $0x240] sm:$0xf] }
  0x52   :  { %601 = vmatpush.bf16.msrb.mxu2 %v1974_v13 }
  0x53   :  { %614 = vmatpush.bf16.msrb.mxu3 %v2038_v60  ;;  %v2755_v60 = vld [vmem:[#allocation7 + $0x2c4] sm:$0xf] }
  0x54   :  { %639 = vmatpush.bf16.msra.mxu1 %v2050_v38  ;;  %626 = vmatpush.bf16.msra.mxu0 %v1986_v4  ;;  %v2745_v38 = vld [vmem:[#allocation7 + $0x274] sm:$0xf]  ;;  %v2194_v2 = vor.u32 %v2755_v60, %v2191_v61  ;;  %v2748_v60 = vld [vmem:[#allocation7 + $0x284] sm:$0xf0]  ;;  %v2747_v61 = vld [vmem:[#allocation7 + $0x284] sm:$0xf] }
  0x56   :  { %602 = vmatpush.bf16.msrb.mxu2 %v1966_v20 }
  0x57   :  { %615 = vmatpush.bf16.msrb.mxu3 %v2030_v8 }
  0x58   :  { %640 = vmatpush.bf16.msra.mxu1 %v2042_v62  ;;  %627 = vmatpush.bf16.msra.mxu0 %v1978_v16  ;;  %v2135_v62 = vld [vmem:[#allocation7 + $0x258] sm:$0xf0] }
  0x59   :  { %v2138_v0 = vor.u32 %v2741_v59, %v2135_v62  ;;  %v2157_v59 = vld [vmem:[#allocation7 + $0x280] sm:$0xf] }
  0x5a   :  { %v2158_v62 = vor.u32 %v2748_v60, %v2157_v59 }
  0x5c   :  { %641 = vmatpush.bf16.msra.mxu1 %v2034_v10  ;;  %628 = vmatpush.bf16.msra.mxu0 %v1970_v22  ;;  %v2754_v22 = vld [vmem:[#allocation7 + $0x2b4] sm:$0xf0] }
  0x5d   :  { %v2182_v24 = vor.u32 %v2754_v22, %v2181_v21  ;;  %v2791_v21 = vld [vmem:[#allocation7 + $0x3e4] sm:$0xf]  ;;  %v2335_v22 = vld [vmem:[#allocation7 + $0x3e8] sm:$0xf0] }
  0x9c   :  { %v129_v41 = vpop.f32.mrf.mxu0 }
  0x9d   :  { %v130_v43 = vadd.f32 %v129_v41, %v102_v39  ;;  %v2151_v39 = vld [vmem:[#allocation7 + $0x278] sm:$0xf0]  ;;  %v2150_v41 = vor.u32 %v2746_v37, %v2149_v33  ;;  %v2752_v33 = vld [vmem:[#allocation7 + $0x2a4] sm:$0xf0] }
  0x9e   :  { %v142_v42 = vpop.f32.mrf.mxu1 }
  0x9f   :  { %v143_v44 = vadd.f32 %v142_v42, %v103_v40  ;;  %v146_v45 = vmax.f32 %v130_v43, 0.0  ;;  %v2210_v40 = vor.u32 %v2759_v31, %v2207_v32  ;;  %v2154_v42 = vor.u32 %v2745_v38, %v2151_v39  ;;  %v2197_v43 = vld [vmem:[#allocation7 + $0x2d0] sm:$0xf]  ;;  %v2127_v31 = vld [vmem:[#allocation7 + $0x248] sm:$0xf0] }
  0xa0   :  { %v2173_v32 = vld [vmem:[#allocation7 + $0x2a0] sm:$0xf]  ;;  %v2751_v38 = vld [vmem:[#allocation7 + $0x2a4] sm:$0xf]  ;;  %v2175_v39 = vld [vmem:[#allocation7 + $0x2a8] sm:$0xf0] }
  0xa1   :  { %v147_v46 = vmax.f32 %v143_v44, 0.0  ;;  %v148_v47 = vpack.c.bf16 %v146_v45, %v146_v45  ;;  %v2758_v44 = vld [vmem:[#allocation7 + $0x2d4] sm:$0xf0]  ;;  %v2757_v45 = vld [vmem:[#allocation7 + $0x2d4] sm:$0xf]  ;;  %v2174_v37 = vor.u32 %v2752_v33, %v2173_v32 }
  0xa2   :  { %v2198_v52 = vor.u32 %v2758_v44, %v2197_v43  ;;  %v2737_v43 = vld [vmem:[#allocation7 + $0x234] sm:$0xf]  ;;  %v2790_v32 = vld [vmem:[#allocation7 + $0x3d4] sm:$0xf0] }
  0xa3   :  { %v149_v48 = vpack.c.bf16 %v147_v46, %v147_v46  ;;  %352 = vmatmul.bf16.vlgmr.msra.gmra.mxu2 %v148_v47  ;;  %378 = vmatmul.bf16.vlgmr.msrb.gmra.mxu0 %v148_v47  ;;  %v2199_v46 = vld [vmem:[#allocation7 + $0x2d8] sm:$0xf0]  ;;  %v2141_v47 = vld [vmem:[#allocation7 + $0x260] sm:$0xf]  ;;  %v2789_v33 = vld [vmem:[#allocation7 + $0x3d4] sm:$0xf] }
  0xa4   :  { %v131_v49 = vpop.f32.mrf.mxu0  ;;  %846 = vmatpush.bf16.msra.mxu2 %v2150_v41  ;;  %872 = vmatpush.bf16.msrb.mxu0 %v2154_v42  ;;  %v2202_v56 = vor.u32 %v2757_v45, %v2199_v46  ;;  %v2117_v41 = vld [vmem:[#allocation7 + $0x230] sm:$0xf]  ;;  %v2738_v42 = vld [vmem:[#allocation7 + $0x234] sm:$0xf0]  ;;  %v2119_v45 = vld [vmem:[#allocation7 + $0x238] sm:$0xf0] }
  0xa5   :  { %365 = vmatmul.bf16.vlgmr.msra.gmra.mxu3 %v149_v48  ;;  %391 = vmatmul.bf16.vlgmr.msrb.gmra.mxu1 %v149_v48  ;;  %v2744_v48 = vld [vmem:[#allocation7 + $0x264] sm:$0xf0]  ;;  %v2118_v44 = vor.u32 %v2738_v42, %v2117_v41  ;;  %v2122_v46 = vor.u32 %v2737_v43, %v2119_v45  ;;  %v2271_v41 = vld [vmem:[#allocation7 + $0x368] sm:$0xf0] }
  0xa6   :  { %v144_v50 = vpop.f32.mrf.mxu1  ;;  %859 = vmatpush.bf16.msra.mxu3 %v2214_v26  ;;  %885 = vmatpush.bf16.msrb.mxu1 %v2218_v30  ;;  %v2142_v49 = vor.u32 %v2744_v48, %v2141_v47  ;;  %v2186_v26 = vor.u32 %v2753_v23, %v2183_v25  ;;  %v2126_v30 = vor.u32 %v2740_v28, %v2125_v27  ;;  %v2165_v47 = vld [vmem:[#allocation7 + $0x290] sm:$0xf]  ;;  %v2750_v48 = vld [vmem:[#allocation7 + $0x294] sm:$0xf0]  ;;  %v2279_v27 = vld [vmem:[#allocation7 + $0x378] sm:$0xf0] }
  0xa7   :  { %v2743_v50 = vld [vmem:[#allocation7 + $0x264] sm:$0xf]  ;;  %v2277_v23 = vld [vmem:[#allocation7 + $0x370] sm:$0xf]  ;;  %v2778_v25 = vld [vmem:[#allocation7 + $0x374] sm:$0xf0]  ;;  %v2338_v28 = vor.u32 %v2791_v21, %v2335_v22 }
  0xa8   :  { %v2146_v53 = vor.u32 %v2743_v50, %v2143_v51  ;;  %847 = vmatpush.bf16.msra.mxu2 %v2142_v49  ;;  %v2166_v49 = vor.u32 %v2750_v48, %v2165_v47  ;;  %v2749_v50 = vld [vmem:[#allocation7 + $0x294] sm:$0xf]  ;;  %v2167_v51 = vld [vmem:[#allocation7 + $0x298] sm:$0xf0]  ;;  %v2788_v45 = vld [vmem:[#allocation7 + $0x3c4] sm:$0xf0] }
  0xa9   :  { %v2261_v47 = vld [vmem:[#allocation7 + $0x350] sm:$0xf]  ;;  %v2774_v48 = vld [vmem:[#allocation7 + $0x354] sm:$0xf0]  ;;  %v2255_v21 = vld [vmem:[#allocation7 + $0x348] sm:$0xf0] }
  0xaa   :  { %860 = vmatpush.bf16.msra.mxu3 %v2206_v34  ;;  %886 = vmatpush.bf16.msrb.mxu1 %v2210_v40  ;;  %v2130_v34 = vor.u32 %v2739_v29, %v2127_v31  ;;  %v2178_v40 = vor.u32 %v2751_v38, %v2175_v39  ;;  %v2278_v29 = vor.u32 %v2778_v25, %v2277_v23  ;;  %v2325_v31 = vld [vmem:[#allocation7 + $0x3d0] sm:$0xf]  ;;  %v2776_v38 = vld [vmem:[#allocation7 + $0x364] sm:$0xf0]  ;;  %v2301_v22 = vld [vmem:[#allocation7 + $0x3a0] sm:$0xf] }
  0xab   :  { %873 = vmatpush.bf16.msrb.mxu0 %v2146_v53  ;;  %v2109_v53 = vld [vmem:[#allocation7 + $0x220] sm:$0xf]  ;;  %v2326_v42 = vor.u32 %v2790_v32, %v2325_v31  ;;  %v2784_v23 = vld [vmem:[#allocation7 + $0x3a4] sm:$0xf0]  ;;  %v2769_v31 = vld [vmem:[#allocation7 + $0x334] sm:$0xf] }
  0xac   :  { %848 = vmatpush.bf16.msra.mxu2 %v2134_v63  ;;  %v2159_v63 = vld [vmem:[#allocation7 + $0x288] sm:$0xf0]  ;;  %v2302_v25 = vor.u32 %v2784_v23, %v2301_v22  ;;  %v2822_v22 = vld [vmem:[#allocation7 + $0x4d4] sm:$0xf0]  ;;  %v2821_v23 = vld [vmem:[#allocation7 + $0x4d4] sm:$0xf] }
  0xae   :  { %861 = vmatpush.bf16.msra.mxu3 %v2198_v52  ;;  %887 = vmatpush.bf16.msrb.mxu1 %v2202_v56  ;;  %v2170_v52 = vor.u32 %v2749_v50, %v2167_v51  ;;  %v2110_v56 = vor.u32 %v2736_v54, %v2109_v53  ;;  %v2787_v50 = vld [vmem:[#allocation7 + $0x3c4] sm:$0xf]  ;;  %v2319_v51 = vld [vmem:[#allocation7 + $0x3c8] sm:$0xf0]  ;;  %v2262_v53 = vor.u32 %v2774_v48, %v2261_v47 }
  0xaf   :  { %874 = vmatpush.bf16.msrb.mxu0 %v2138_v0  ;;  %v2162_v0 = vor.u32 %v2747_v61, %v2159_v63  ;;  %v2322_v57 = vor.u32 %v2787_v50, %v2319_v51  ;;  %v2239_v47 = vld [vmem:[#allocation7 + $0x328] sm:$0xf0]  ;;  %v2780_v50 = vld [vmem:[#allocation7 + $0x384] sm:$0xf0]  ;;  %v2779_v51 = vld [vmem:[#allocation7 + $0x384] sm:$0xf] }
  0xb0   :  { %849 = vmatpush.bf16.msra.mxu2 %v2126_v30 }
  0xb2   :  { %862 = vmatpush.bf16.msra.mxu3 %v2190_v1  ;;  %888 = vmatpush.bf16.msrb.mxu1 %v2194_v2  ;;  %v2101_v1 = vld [vmem:[#allocation7 + $0x210] sm:$0xf]  ;;  %v2734_v2 = vld [vmem:[#allocation7 + $0x214] sm:$0xf0] }
  0xb3   :  { %875 = vmatpush.bf16.msrb.mxu0 %v2130_v34  ;;  %v2327_v34 = vld [vmem:[#allocation7 + $0x3d8] sm:$0xf0] }
  0xb4   :  { %850 = vmatpush.bf16.msra.mxu2 %v2118_v44  ;;  %v2317_v44 = vld [vmem:[#allocation7 + $0x3c0] sm:$0xf] }
  0xb5   :  { %v2318_v55 = vor.u32 %v2788_v45, %v2317_v44  ;;  %v2768_v44 = vld [vmem:[#allocation7 + $0x324] sm:$0xf0]  ;;  %v2767_v45 = vld [vmem:[#allocation7 + $0x324] sm:$0xf] }
  0xb6   :  { %863 = vmatpush.bf16.msra.mxu3 %v2182_v24  ;;  %889 = vmatpush.bf16.msrb.mxu1 %v2186_v26  ;;  %v2777_v26 = vld [vmem:[#allocation7 + $0x374] sm:$0xf]  ;;  %v2242_v48 = vor.u32 %v2767_v45, %v2239_v47 }
  0xb7   :  { %876 = vmatpush.bf16.msrb.mxu0 %v2122_v46  ;;  %v2282_v30 = vor.u32 %v2777_v26, %v2279_v27  ;;  %v2330_v46 = vor.u32 %v2789_v33, %v2327_v34  ;;  %v2783_v26 = vld [vmem:[#allocation7 + $0x3a4] sm:$0xf]  ;;  %v2303_v27 = vld [vmem:[#allocation7 + $0x3a8] sm:$0xf0]  ;;  %v2247_v33 = vld [vmem:[#allocation7 + $0x338] sm:$0xf0] }
  0xb8   :  { %851 = vmatpush.bf16.msra.mxu2 %v2110_v56  ;;  %v2250_v34 = vor.u32 %v2769_v31, %v2247_v33  ;;  %v2820_v33 = vld [vmem:[#allocation7 + $0x4c4] sm:$0xf0] }
  0xba   :  { %864 = vmatpush.bf16.msra.mxu3 %v2174_v37  ;;  %890 = vmatpush.bf16.msrb.mxu1 %v2178_v40  ;;  %v2269_v37 = vld [vmem:[#allocation7 + $0x360] sm:$0xf]  ;;  %v2775_v40 = vld [vmem:[#allocation7 + $0x364] sm:$0xf] }
  0xbb   :  { %877 = vmatpush.bf16.msrb.mxu0 %v2114_v58  ;;  %v2270_v39 = vor.u32 %v2776_v38, %v2269_v37  ;;  %v2274_v43 = vor.u32 %v2775_v40, %v2271_v41  ;;  %v434_v58 = vperm.slane %v3106_v36, 2  ;;  %v2293_v37 = vld [vmem:[#allocation7 + $0x390] sm:$0xf]  ;;  %v2782_v38 = vld [vmem:[#allocation7 + $0x394] sm:$0xf0] }
  0xbc   :  { %v2781_v40 = vld [vmem:[#allocation7 + $0x394] sm:$0xf]  ;;  %v2295_v41 = vld [vmem:[#allocation7 + $0x398] sm:$0xf0] }
  0xbe   :  { %865 = vmatpush.bf16.msra.mxu3 %v2166_v49  ;;  %891 = vmatpush.bf16.msrb.mxu1 %v2170_v52  ;;  %v2773_v49 = vld [vmem:[#allocation7 + $0x354] sm:$0xf]  ;;  %v2263_v52 = vld [vmem:[#allocation7 + $0x358] sm:$0xf0] }
  0xbf   :  { %v2266_v54 = vor.u32 %v2773_v49, %v2263_v52  ;;  %v2285_v49 = vld [vmem:[#allocation7 + $0x380] sm:$0xf] }
  0xc0   :  { %v2286_v52 = vor.u32 %v2780_v50, %v2285_v49 }
  0xc2   :  { %866 = vmatpush.bf16.msra.mxu3 %v2158_v62  ;;  %892 = vmatpush.bf16.msrb.mxu1 %v2162_v0  ;;  %v433_v0 = vperm.slane %v3104_v35, 2 }
 0x120   :  { %v379_v4 = vpop.f32.mrf.mxu0 }
 0x121   :  { %v380_v6 = vadd.f32 %v379_v4, %v183_v3  ;;  %v2102_v3 = vor.u32 %v2734_v2, %v2101_v1  ;;  %v2733_v4 = vld [vmem:[#allocation7 + $0x214] sm:$0xf] }
 0x122   :  { %v392_v5 = vpop.f32.mrf.mxu1 }
 0x123   :  { %v393_v8 = vadd.f32 %v392_v5, %v380_v6  ;;  %v2103_v5 = vld [vmem:[#allocation7 + $0x218] sm:$0xf0]  ;;  %852 = vmatpush.bf16.msra.mxu2 %v2102_v3 }
 0x124   :  { %v2106_v6 = vor.u32 %v2733_v4, %v2103_v5 }
 0x125   :  { %v397_v9 = vmax.f32 %v393_v8, 0.0  ;;  %v2732_v8 = vld [vmem:[#allocation7 + $0x204] sm:$0xf0] }
 0x126   :  { %v353_v10 = vpop.f32.mrf.mxu2  ;;  %878 = vmatpush.bf16.msrb.mxu0 %v2106_v6 }
 0x127   :  { %v354_v12 = vadd.f32 %v353_v10, %v182_v7  ;;  %v399_v13 = vpack.c.bf16 %v397_v9, %v397_v9  ;;  %v2093_v7 = vld [vmem:[#allocation7 + $0x200] sm:$0xf]  ;;  %v2731_v9 = vld [vmem:[#allocation7 + $0x204] sm:$0xf] }
 0x128   :  { %v366_v11 = vpop.f32.mrf.mxu3  ;;  %v381_v15 = vpop.f32.mrf.mxu0  ;;  %v2094_v10 = vor.u32 %v2732_v8, %v2093_v7 }
 0x129   :  { %v367_v14 = vadd.f32 %v366_v11, %v354_v12  ;;  %616 = vmatmul.bf16.vlgmr.msrb.gmra.mxu3 %v399_v13  ;;  %642 = vmatmul.bf16.vlgmr.msra.gmra.mxu1 %v399_v13  ;;  %v2095_v11 = vld [vmem:[#allocation7 + $0x208] sm:$0xf0]  ;;  %v2341_v13 = vld [vmem:[#allocation7 + $0x3f0] sm:$0xf]  ;;  %v2793_v15 = vld [vmem:[#allocation7 + $0x3f4] sm:$0xf] }
 0x12a   :  { %v394_v16 = vpop.f32.mrf.mxu1  ;;  %v2098_v12 = vor.u32 %v2731_v9, %v2095_v11  ;;  %853 = vmatpush.bf16.msra.mxu2 %v2094_v10  ;;  %v2309_v11 = vld [vmem:[#allocation7 + $0x3b0] sm:$0xf] }
 0x12b   :  { %v396_v17 = vmax.f32 %v367_v14, 0.0  ;;  %v2794_v14 = vld [vmem:[#allocation7 + $0x3f4] sm:$0xf0] }
 0x12c   :  { %879 = vmatpush.bf16.msrb.mxu0 %v2098_v12  ;;  %v2342_v16 = vor.u32 %v2794_v14, %v2341_v13  ;;  %v2786_v12 = vld [vmem:[#allocation7 + $0x3b4] sm:$0xf0]  ;;  %v2785_v13 = vld [vmem:[#allocation7 + $0x3b4] sm:$0xf] }
 0x12d   :  { %v398_v18 = vpack.c.bf16 %v396_v17, %v396_v17  ;;  %v2343_v17 = vld [vmem:[#allocation7 + $0x3f8] sm:$0xf0]  ;;  %v2310_v14 = vor.u32 %v2786_v12, %v2309_v11  ;;  %v2823_v11 = vld [vmem:[#allocation7 + $0x4e4] sm:$0xf]  ;;  %v2463_v12 = vld [vmem:[#allocation7 + $0x4e8] sm:$0xf0] }
 0x12e   :  { %v355_v19 = vpop.f32.mrf.mxu2  ;;  %1110 = vmatpush.bf16.msrb.mxu3 %v2342_v16 }
 0x12f   :  { %603 = vmatmul.bf16.vlgmr.msrb.gmra.mxu2 %v398_v18  ;;  %629 = vmatmul.bf16.vlgmr.msra.gmra.mxu0 %v398_v18  ;;  %v2333_v18 = vld [vmem:[#allocation7 + $0x3e0] sm:$0xf]  ;;  %v2792_v19 = vld [vmem:[#allocation7 + $0x3e4] sm:$0xf0] }
 0x130   :  { %v368_v20 = vpop.f32.mrf.mxu3  ;;  %v2334_v24 = vor.u32 %v2792_v19, %v2333_v18  ;;  %1097 = vmatpush.bf16.msrb.mxu2 %v2278_v29  ;;  %1123 = vmatpush.bf16.msra.mxu0 %v2282_v30  ;;  %v2772_v18 = vld [vmem:[#allocation7 + $0x344] sm:$0xf0]  ;;  %v2771_v19 = vld [vmem:[#allocation7 + $0x344] sm:$0xf]  ;;  %v2245_v29 = vld [vmem:[#allocation7 + $0x330] sm:$0xf] }
 0x131   :  { %v2346_v20 = vor.u32 %v2793_v15, %v2343_v17  ;;  %v2311_v15 = vld [vmem:[#allocation7 + $0x3b8] sm:$0xf0]  ;;  %v2253_v17 = vld [vmem:[#allocation7 + $0x340] sm:$0xf]  ;;  %v2770_v30 = vld [vmem:[#allocation7 + $0x334] sm:$0xf0] }
 0x132   :  { %1111 = vmatpush.bf16.msrb.mxu3 %v2334_v24  ;;  %v2314_v16 = vor.u32 %v2785_v13, %v2311_v15  ;;  %v2258_v24 = vor.u32 %v2771_v19, %v2255_v21  ;;  %v2246_v32 = vor.u32 %v2770_v30, %v2245_v29  ;;  %v2405_v13 = vld [vmem:[#allocation7 + $0x470] sm:$0xf]  ;;  %v2810_v15 = vld [vmem:[#allocation7 + $0x474] sm:$0xf0]  ;;  %v2399_v29 = vld [vmem:[#allocation7 + $0x468] sm:$0xf0] }
 0x133   :  { %1136 = vmatpush.bf16.msra.mxu1 %v2346_v20  ;;  %v2254_v20 = vor.u32 %v2772_v18, %v2253_v17  ;;  %v2407_v17 = vld [vmem:[#allocation7 + $0x478] sm:$0xf0]  ;;  %v2466_v18 = vor.u32 %v2823_v11, %v2463_v12  ;;  %v2406_v19 = vor.u32 %v2810_v15, %v2405_v13  ;;  %v2453_v21 = vld [vmem:[#allocation7 + $0x4d0] sm:$0xf]  ;;  %v2816_v11 = vld [vmem:[#allocation7 + $0x4a4] sm:$0xf0] }
 0x134   :  { %1098 = vmatpush.bf16.msrb.mxu2 %v2270_v39  ;;  %1124 = vmatpush.bf16.msra.mxu0 %v2274_v43  ;;  %v2294_v39 = vor.u32 %v2782_v38, %v2293_v37  ;;  %v2237_v43 = vld [vmem:[#allocation7 + $0x320] sm:$0xf]  ;;  %v2454_v30 = vor.u32 %v2822_v22, %v2453_v21  ;;  %v2389_v37 = vld [vmem:[#allocation7 + $0x450] sm:$0xf]  ;;  %v2806_v38 = vld [vmem:[#allocation7 + $0x454] sm:$0xf0] }
 0x135   :  { %v2431_v15 = vld [vmem:[#allocation7 + $0x4a8] sm:$0xf0]  ;;  %v2375_v21 = vld [vmem:[#allocation7 + $0x438] sm:$0xf0] }
 0x136   :  { %1112 = vmatpush.bf16.msrb.mxu3 %v2326_v42  ;;  %v2298_v42 = vor.u32 %v2781_v40, %v2295_v41  ;;  %v2819_v40 = vld [vmem:[#allocation7 + $0x4c4] sm:$0xf]  ;;  %v2447_v41 = vld [vmem:[#allocation7 + $0x4c8] sm:$0xf0] }
 0x137   :  { %1137 = vmatpush.bf16.msra.mxu1 %v2338_v28  ;;  %v2306_v28 = vor.u32 %v2783_v26, %v2303_v27  ;;  %v2808_v26 = vld [vmem:[#allocation7 + $0x464] sm:$0xf0]  ;;  %v2450_v47 = vor.u32 %v2819_v40, %v2447_v41  ;;  %v2415_v41 = vld [vmem:[#allocation7 + $0x488] sm:$0xf0] }
 0x138   :  { %1099 = vmatpush.bf16.msrb.mxu2 %v2262_v53  ;;  %1125 = vmatpush.bf16.msra.mxu0 %v2266_v54  ;;  %v2287_v53 = vld [vmem:[#allocation7 + $0x388] sm:$0xf0] }
 0x139   :  { %v2290_v54 = vor.u32 %v2779_v51, %v2287_v53 }
 0x13a   :  { %1113 = vmatpush.bf16.msrb.mxu3 %v2318_v55  ;;  %v2229_v55 = vld [vmem:[#allocation7 + $0x310] sm:$0xf] }
 0x13b   :  { %1138 = vmatpush.bf16.msra.mxu1 %v2330_v46  ;;  %v2238_v46 = vor.u32 %v2768_v44, %v2237_v43  ;;  %v2390_v43 = vor.u32 %v2806_v38, %v2389_v37  ;;  %v2413_v37 = vld [vmem:[#allocation7 + $0x480] sm:$0xf]  ;;  %v2812_v38 = vld [vmem:[#allocation7 + $0x484] sm:$0xf0] }
 0x13c   :  { %1100 = vmatpush.bf16.msrb.mxu2 %v2254_v20  ;;  %1126 = vmatpush.bf16.msra.mxu0 %v2258_v24  ;;  %v2455_v24 = vld [vmem:[#allocation7 + $0x4d8] sm:$0xf0]  ;;  %v2414_v40 = vor.u32 %v2812_v38, %v2413_v37 }
 0x13e   :  { %1114 = vmatpush.bf16.msrb.mxu3 %v2310_v14 }
 0x13f   :  { %1139 = vmatpush.bf16.msra.mxu1 %v2322_v57 }
 0x140   :  { %1101 = vmatpush.bf16.msrb.mxu2 %v2246_v32  ;;  %1127 = vmatpush.bf16.msra.mxu0 %v2250_v34  ;;  %v2445_v32 = vld [vmem:[#allocation7 + $0x4c0] sm:$0xf]  ;;  %v2458_v34 = vor.u32 %v2821_v23, %v2455_v24  ;;  %v2421_v23 = vld [vmem:[#allocation7 + $0x490] sm:$0xf]  ;;  %v2814_v24 = vld [vmem:[#allocation7 + $0x494] sm:$0xf0] }
 0x142   :  { %1115 = vmatpush.bf16.msrb.mxu3 %v2302_v25  ;;  %v2397_v25 = vld [vmem:[#allocation7 + $0x460] sm:$0xf] }
 0x143   :  { %1140 = vmatpush.bf16.msra.mxu1 %v2314_v16  ;;  %v2809_v16 = vld [vmem:[#allocation7 + $0x474] sm:$0xf]  ;;  %v2398_v27 = vor.u32 %v2808_v26, %v2397_v25  ;;  %v2422_v25 = vor.u32 %v2814_v24, %v2421_v23  ;;  %v2851_v24 = vld [vmem:[#allocation7 + $0x5c4] sm:$0xf] }
 0x144   :  { %1102 = vmatpush.bf16.msrb.mxu2 %v2238_v46  ;;  %1128 = vmatpush.bf16.msra.mxu0 %v2242_v48  ;;  %v2410_v20 = vor.u32 %v2809_v16, %v2407_v17  ;;  %v2446_v46 = vor.u32 %v2820_v33, %v2445_v32  ;;  %v685_v48 = vperm.slane %v3106_v36, 3  ;;  %v2373_v17 = vld [vmem:[#allocation7 + $0x430] sm:$0xf]  ;;  %v2813_v26 = vld [vmem:[#allocation7 + $0x494] sm:$0xf] }
 0x145   :  { %v2367_v33 = vld [vmem:[#allocation7 + $0x428] sm:$0xf0]  ;;  %v2837_v23 = vld [vmem:[#allocation7 + $0x554] sm:$0xf] }
 0x146   :  { %1116 = vmatpush.bf16.msrb.mxu3 %v2294_v39  ;;  %v2805_v39 = vld [vmem:[#allocation7 + $0x454] sm:$0xf] }
 0x147   :  { %1141 = vmatpush.bf16.msra.mxu1 %v2306_v28  ;;  %v2807_v28 = vld [vmem:[#allocation7 + $0x464] sm:$0xf] }
 0x148   :  { %v2402_v31 = vor.u32 %v2807_v28, %v2399_v29  ;;  %v2365_v29 = vld [vmem:[#allocation7 + $0x420] sm:$0xf] }
 0x14a   :  { %1117 = vmatpush.bf16.msrb.mxu3 %v2286_v52 }
 0x14b   :  { %1142 = vmatpush.bf16.msra.mxu1 %v2298_v42  ;;  %v2391_v42 = vld [vmem:[#allocation7 + $0x458] sm:$0xf0] }
 0x14c   :  { %v2394_v44 = vor.u32 %v2805_v39, %v2391_v42  ;;  %v2811_v39 = vld [vmem:[#allocation7 + $0x484] sm:$0xf] }
 0x14d   :  { %v2418_v42 = vor.u32 %v2811_v39, %v2415_v41  ;;  %v3119_v41 = vld [vmem:[#allocation8] sm:$0x7f] }
 0x14f   :  { %1143 = vmatpush.bf16.msra.mxu1 %v2290_v54  ;;  %v684_v54 = vperm.slane %v3104_v35, 3 }
 0x1a6   :  { %v643_v56 = vpop.f32.mrf.mxu1 }
 0x1ac   :  { %v630_v59 = vpop.f32.mrf.mxu0  ;;  %v617_v60 = vpop.f32.mrf.mxu3 }
 0x1ad   :  { %v631_v61 = vadd.f32 %v630_v59, %v434_v58  ;;  %v2765_v58 = vld [vmem:[#allocation7 + $0x314] sm:$0xf]  ;;  %v2231_v59 = vld [vmem:[#allocation7 + $0x318] sm:$0xf0] }
 0x1ae   :  { %v645_v63 = vpop.f32.mrf.mxu1 }
 0x1af   :  { %v644_v62 = vadd.f32 %v643_v56, %v631_v61  ;;  %v2766_v56 = vld [vmem:[#allocation7 + $0x314] sm:$0xf0]  ;;  %v2221_v61 = vld [vmem:[#allocation7 + $0x300] sm:$0xf]  ;;  %v2763_v63 = vld [vmem:[#allocation7 + $0x304] sm:$0xf] }
 0x1b0   :  { %v2230_v57 = vor.u32 %v2766_v56, %v2229_v55 }
 0x1b1   :  { %v648_v1 = vmax.f32 %v644_v62, 0.0  ;;  %v2764_v62 = vld [vmem:[#allocation7 + $0x304] sm:$0xf0] }
 0x1b2   :  { %v604_v2 = vpop.f32.mrf.mxu2  ;;  %1103 = vmatpush.bf16.msrb.mxu2 %v2230_v57 }
 0x1b3   :  { %v650_v3 = vpack.c.bf16 %v648_v1, %v648_v1  ;;  %v605_v4 = vadd.f32 %v604_v2, %v433_v0  ;;  %v2222_v0 = vor.u32 %v2764_v62, %v2221_v61  ;;  %v2223_v1 = vld [vmem:[#allocation7 + $0x308] sm:$0xf0] }
 0x1b4   :  { %v632_v5 = vpop.f32.mrf.mxu0  ;;  %v619_v7 = vpop.f32.mrf.mxu3  ;;  %v2226_v2 = vor.u32 %v2763_v63, %v2223_v1  ;;  %v2818_v1 = vld [vmem:[#allocation7 + $0x4b4] sm:$0xf0] }
 0x1b5   :  { %v618_v6 = vadd.f32 %v617_v60, %v605_v4  ;;  %867 = vmatmul.bf16.vlgmr.msra.gmra.mxu3 %v650_v3  ;;  %893 = vmatmul.bf16.vlgmr.msrb.gmra.mxu1 %v650_v3  ;;  %v2234_v60 = vor.u32 %v2765_v58, %v2231_v59  ;;  %v2469_v3 = vld [vmem:[#allocation7 + $0x4f0] sm:$0xf]  ;;  %v2826_v4 = vld [vmem:[#allocation7 + $0x4f4] sm:$0xf0]  ;;  %v2825_v5 = vld [vmem:[#allocation7 + $0x4f4] sm:$0xf] }
 0x1b6   :  { %1104 = vmatpush.bf16.msrb.mxu2 %v2222_v0  ;;  %v2471_v7 = vld [vmem:[#allocation7 + $0x4f8] sm:$0xf0]  ;;  %v2437_v0 = vld [vmem:[#allocation7 + $0x4b0] sm:$0xf] }
 0x1b7   :  { %v647_v8 = vmax.f32 %v618_v6, 0.0  ;;  %1129 = vmatpush.bf16.msra.mxu0 %v2234_v60  ;;  %v2470_v6 = vor.u32 %v2826_v4, %v2469_v3  ;;  %v2438_v3 = vor.u32 %v2818_v1, %v2437_v0  ;;  %v2439_v4 = vld [vmem:[#allocation7 + $0x4b8] sm:$0xf0]  ;;  %v2533_v0 = vld [vmem:[#allocation7 + $0x570] sm:$0xf] }
 0x1b9   :  { %v649_v9 = vpack.c.bf16 %v647_v8, %v647_v8  ;;  %v2461_v8 = vld [vmem:[#allocation7 + $0x4e0] sm:$0xf]  ;;  %1361 = vmatpush.bf16.msra.mxu3 %v2470_v6  ;;  %v2804_v6 = vld [vmem:[#allocation7 + $0x444] sm:$0xf0] }
 0x1ba   :  { %v606_v10 = vpop.f32.mrf.mxu2 }
 0x1bb   :  { %854 = vmatmul.bf16.vlgmr.msra.gmra.mxu2 %v649_v9  ;;  %880 = vmatmul.bf16.vlgmr.msrb.gmra.mxu0 %v649_v9  ;;  %v2824_v9 = vld [vmem:[#allocation7 + $0x4e4] sm:$0xf0]  ;;  %v2474_v10 = vor.u32 %v2825_v5, %v2471_v7  ;;  %v2381_v5 = vld [vmem:[#allocation7 + $0x440] sm:$0xf]  ;;  %v2803_v7 = vld [vmem:[#allocation7 + $0x444] sm:$0xf] }
 0x1bc   :  { %1130 = vmatpush.bf16.msra.mxu0 %v2226_v2  ;;  %v2462_v14 = vor.u32 %v2824_v9, %v2461_v8  ;;  %1348 = vmatpush.bf16.msra.mxu2 %v2406_v19  ;;  %v2817_v2 = vld [vmem:[#allocation7 + $0x4b4] sm:$0xf]  ;;  %v2382_v8 = vor.u32 %v2804_v6, %v2381_v5  ;;  %v2383_v9 = vld [vmem:[#allocation7 + $0x448] sm:$0xf0] }
 0x1bd   :  { %1387 = vmatpush.bf16.msrb.mxu1 %v2474_v10  ;;  %v2442_v35 = vor.u32 %v2817_v2, %v2439_v4  ;;  %v2429_v10 = vld [vmem:[#allocation7 + $0x4a0] sm:$0xf]  ;;  %v2386_v12 = vor.u32 %v2803_v7, %v2383_v9  ;;  %v2801_v19 = vld [vmem:[#allocation7 + $0x434] sm:$0xf]  ;;  %v2842_v2 = vld [vmem:[#allocation7 + $0x574] sm:$0xf0] }
 0x1be   :  { %1362 = vmatpush.bf16.msra.mxu3 %v2462_v14  ;;  %v2430_v13 = vor.u32 %v2816_v11, %v2429_v10  ;;  %v2815_v14 = vld [vmem:[#allocation7 + $0x4a4] sm:$0xf]  ;;  %v2378_v22 = vor.u32 %v2801_v19, %v2375_v21  ;;  %v2535_v4 = vld [vmem:[#allocation7 + $0x578] sm:$0xf0]  ;;  %v2534_v5 = vor.u32 %v2842_v2, %v2533_v0  ;;  %v2581_v7 = vld [vmem:[#allocation7 + $0x5d0] sm:$0xf] }
 0x1bf   :  { %v2434_v16 = vor.u32 %v2815_v14, %v2431_v15  ;;  %v2853_v9 = vld [vmem:[#allocation7 + $0x5d4] sm:$0xf]  ;;  %v2583_v10 = vld [vmem:[#allocation7 + $0x5d8] sm:$0xf0]  ;;  %v2525_v11 = vld [vmem:[#allocation7 + $0x560] sm:$0xf] }
 0x1c0   :  { %1374 = vmatpush.bf16.msrb.mxu0 %v2410_v20  ;;  %1349 = vmatpush.bf16.msra.mxu2 %v2398_v27  ;;  %v2423_v27 = vld [vmem:[#allocation7 + $0x498] sm:$0xf0]  ;;  %v2839_v14 = vld [vmem:[#allocation7 + $0x564] sm:$0xf]  ;;  %v2527_v15 = vld [vmem:[#allocation7 + $0x568] sm:$0xf0] }
 0x1c1   :  { %1388 = vmatpush.bf16.msrb.mxu1 %v2466_v18  ;;  %v2802_v18 = vld [vmem:[#allocation7 + $0x434] sm:$0xf0]  ;;  %v2426_v28 = vor.u32 %v2813_v26, %v2423_v27  ;;  %v2852_v19 = vld [vmem:[#allocation7 + $0x5c4] sm:$0xf0]  ;;  %v2517_v21 = vld [vmem:[#allocation7 + $0x550] sm:$0xf] }
 0x1c2   :  { %1363 = vmatpush.bf16.msra.mxu3 %v2454_v30  ;;  %v2374_v20 = vor.u32 %v2802_v18, %v2373_v17  ;;  %v2800_v30 = vld [vmem:[#allocation7 + $0x424] sm:$0xf0]  ;;  %v2530_v17 = vor.u32 %v2839_v14, %v2527_v15  ;;  %v2573_v18 = vld [vmem:[#allocation7 + $0x5c0] sm:$0xf]  ;;  %v2519_v26 = vld [vmem:[#allocation7 + $0x558] sm:$0xf0] }
 0x1c3   :  { %v2366_v32 = vor.u32 %v2800_v30, %v2365_v29  ;;  %v2574_v30 = vor.u32 %v2852_v19, %v2573_v18  ;;  %v2848_v0 = vld [vmem:[#allocation7 + $0x5a4] sm:$0xf0]  ;;  %v2845_v14 = vld [vmem:[#allocation7 + $0x594] sm:$0xf]  ;;  %v2551_v15 = vld [vmem:[#allocation7 + $0x598] sm:$0xf0] }
 0x1c4   :  { %1375 = vmatpush.bf16.msrb.mxu0 %v2402_v31  ;;  %1350 = vmatpush.bf16.msra.mxu2 %v2390_v43  ;;  %v2799_v31 = vld [vmem:[#allocation7 + $0x424] sm:$0xf]  ;;  %v2357_v43 = vld [vmem:[#allocation7 + $0x410] sm:$0xf]  ;;  %v2832_v18 = vld [vmem:[#allocation7 + $0x524] sm:$0xf0] }
 0x1c5   :  { %1389 = vmatpush.bf16.msrb.mxu1 %v2458_v34  ;;  %v2370_v34 = vor.u32 %v2799_v31, %v2367_v33  ;;  %v2831_v19 = vld [vmem:[#allocation7 + $0x524] sm:$0xf] }
 0x1c6   :  { %1364 = vmatpush.bf16.msra.mxu3 %v2446_v46  ;;  %v2797_v46 = vld [vmem:[#allocation7 + $0x414] sm:$0xf] }
 0x1c8   :  { %1376 = vmatpush.bf16.msrb.mxu0 %v2394_v44  ;;  %1351 = vmatpush.bf16.msra.mxu2 %v2382_v8  ;;  %v2798_v44 = vld [vmem:[#allocation7 + $0x414] sm:$0xf0] }
 0x1c9   :  { %1390 = vmatpush.bf16.msrb.mxu1 %v2450_v47  ;;  %v2359_v47 = vld [vmem:[#allocation7 + $0x418] sm:$0xf0]  ;;  %v2854_v8 = vld [vmem:[#allocation7 + $0x5d4] sm:$0xf0] }
 0x1ca   :  { %1365 = vmatpush.bf16.msra.mxu3 %v2438_v3  ;;  %v2841_v3 = vld [vmem:[#allocation7 + $0x574] sm:$0xf] }
 0x1cb   :  { %v2538_v6 = vor.u32 %v2841_v3, %v2535_v4  ;;  %v2847_v3 = vld [vmem:[#allocation7 + $0x5a4] sm:$0xf]  ;;  %v2559_v4 = vld [vmem:[#allocation7 + $0x5a8] sm:$0xf0] }
 0x1cc   :  { %1377 = vmatpush.bf16.msrb.mxu0 %v2386_v12  ;;  %1352 = vmatpush.bf16.msra.mxu2 %v2374_v20  ;;  %v2840_v12 = vld [vmem:[#allocation7 + $0x564] sm:$0xf0]  ;;  %v2586_v20 = vor.u32 %v2853_v9, %v2583_v10  ;;  %v2503_v9 = vld [vmem:[#allocation7 + $0x538] sm:$0xf0] }
 0x1cd   :  { %1391 = vmatpush.bf16.msrb.mxu1 %v2442_v35 }
 0x1ce   :  { %1366 = vmatpush.bf16.msra.mxu3 %v2430_v13  ;;  %v2526_v13 = vor.u32 %v2840_v12, %v2525_v11  ;;  %v2549_v11 = vld [vmem:[#allocation7 + $0x590] sm:$0xf]  ;;  %v2846_v12 = vld [vmem:[#allocation7 + $0x594] sm:$0xf0] }
 0x1d0   :  { %1378 = vmatpush.bf16.msrb.mxu0 %v2378_v22  ;;  %1353 = vmatpush.bf16.msra.mxu2 %v2366_v32  ;;  %v2838_v22 = vld [vmem:[#allocation7 + $0x554] sm:$0xf0]  ;;  %v3116_v32 = vld [vmem:[#allocation8 + $0x8] sm:$0x7f] }
 0x1d1   :  { %1392 = vmatpush.bf16.msrb.mxu1 %v2434_v16  ;;  %v2582_v16 = vor.u32 %v2854_v8, %v2581_v7  ;;  %v2518_v27 = vor.u32 %v2838_v22, %v2517_v21  ;;  %v936_v33 = vperm.slane %v3116_v32, 4  ;;  %v2833_v7 = vld [vmem:[#allocation7 + $0x534] sm:$0xf]  ;;  %v2495_v21 = vld [vmem:[#allocation7 + $0x528] sm:$0xf0] }
 0x1d2   :  { %1367 = vmatpush.bf16.msra.mxu3 %v2422_v25  ;;  %v2575_v25 = vld [vmem:[#allocation7 + $0x5c8] sm:$0xf0]  ;;  %v2506_v10 = vor.u32 %v2833_v7, %v2503_v9  ;;  %v2498_v22 = vor.u32 %v2831_v19, %v2495_v21  ;;  %v2861_v9 = vld [vmem:[#allocation10 + $0x10] sm:$0xff] }
 0x1d3   :  { %v2578_v31 = vor.u32 %v2851_v24, %v2575_v25  ;;  %v2844_v24 = vld [vmem:[#allocation7 + $0x584] sm:$0xf0]  ;;  %v2843_v25 = vld [vmem:[#allocation7 + $0x584] sm:$0xf] }
 0x1d4   :  { %1379 = vmatpush.bf16.msrb.mxu0 %v2370_v34  ;;  %v2862_v7 = vld [vmem:[#allocation10 + $0x18] sm:$0xff] }
 0x1d5   :  { %1393 = vmatpush.bf16.msrb.mxu1 %v2426_v28  ;;  %v2522_v28 = vor.u32 %v2837_v23, %v2519_v26  ;;  %v2541_v23 = vld [vmem:[#allocation7 + $0x580] sm:$0xf] }
 0x1d6   :  { %1368 = vmatpush.bf16.msra.mxu3 %v2414_v40  ;;  %v2542_v26 = vor.u32 %v2844_v24, %v2541_v23 }
 0x1d9   :  { %1394 = vmatpush.bf16.msrb.mxu1 %v2418_v42  ;;  %v935_v42 = vperm.slane %v3119_v41, 4 }
 0x232   :  { %v894_v45 = vpop.f32.mrf.mxu1 }
 0x238   :  { %v868_v49 = vpop.f32.mrf.mxu3  ;;  %v881_v50 = vpop.f32.mrf.mxu0 }
 0x239   :  { %v882_v51 = vadd.f32 %v881_v50, %v685_v48  ;;  %v2362_v48 = vor.u32 %v2797_v46, %v2359_v47  ;;  %v2796_v50 = vld [vmem:[#allocation7 + $0x404] sm:$0xf0] }
 0x23a   :  { %v896_v52 = vpop.f32.mrf.mxu1 }
 0x23b   :  { %v895_v53 = vadd.f32 %v894_v45, %v882_v51  ;;  %v2358_v45 = vor.u32 %v2798_v44, %v2357_v43  ;;  %1380 = vmatpush.bf16.msrb.mxu0 %v2362_v48  ;;  %v2795_v51 = vld [vmem:[#allocation7 + $0x404] sm:$0xf] }
 0x23d   :  { %v899_v55 = vmax.f32 %v895_v53, 0.0  ;;  %1354 = vmatpush.bf16.msra.mxu2 %v2358_v45  ;;  %v2351_v53 = vld [vmem:[#allocation7 + $0x408] sm:$0xf0] }
 0x23e   :  { %v855_v56 = vpop.f32.mrf.mxu2 }
 0x23f   :  { %v901_v57 = vpack.c.bf16 %v899_v55, %v899_v55  ;;  %v856_v58 = vadd.f32 %v855_v56, %v684_v54  ;;  %v2354_v54 = vor.u32 %v2795_v51, %v2351_v53  ;;  %v2597_v55 = vld [vmem:[#allocation7 + $0x5f0] sm:$0xf]  ;;  %v2858_v56 = vld [vmem:[#allocation7 + $0x5f4] sm:$0xf0] }
 0x240   :  { %v870_v59 = vpop.f32.mrf.mxu3  ;;  %v883_v60 = vpop.f32.mrf.mxu0  ;;  %v2565_v53 = vld [vmem:[#allocation7 + $0x5b0] sm:$0xf] }
 0x241   :  { %v869_v61 = vadd.f32 %v868_v49, %v856_v58  ;;  %1118 = vmatmul.bf16.vlgmr.msrb.gmra.mxu3 %v901_v57  ;;  %1144 = vmatmul.bf16.vlgmr.msra.gmra.mxu1 %v901_v57  ;;  %v2349_v49 = vld [vmem:[#allocation7 + $0x400] sm:$0xf]  ;;  %v2857_v57 = vld [vmem:[#allocation7 + $0x5f4] sm:$0xf]  ;;  %v2598_v58 = vor.u32 %v2858_v56, %v2597_v55  ;;  %v2599_v59 = vld [vmem:[#allocation7 + $0x5f8] sm:$0xf0] }
 0x242   :  { %v2350_v52 = vor.u32 %v2796_v50, %v2349_v49  ;;  %1381 = vmatpush.bf16.msrb.mxu0 %v2354_v54  ;;  %v2589_v60 = vld [vmem:[#allocation7 + $0x5e0] sm:$0xf]  ;;  %v2850_v54 = vld [vmem:[#allocation7 + $0x5b4] sm:$0xf0]  ;;  %v2849_v55 = vld [vmem:[#allocation7 + $0x5b4] sm:$0xf] }
 0x243   :  { %v898_v36 = vmax.f32 %v869_v61, 0.0  ;;  %v2856_v61 = vld [vmem:[#allocation7 + $0x5e4] sm:$0xf0]  ;;  %1612 = vmatpush.bf16.msrb.mxu3 %v2598_v58  ;;  %v2566_v56 = vor.u32 %v2850_v54, %v2565_v53  ;;  %v1187_v53 = vperm.slane %v3116_v32, 5 }
 0x244   :  { %1355 = vmatpush.bf16.msra.mxu2 %v2350_v52  ;;  %v2590_v1 = vor.u32 %v2856_v61, %v2589_v60  ;;  %v2836_v60 = vld [vmem:[#allocation7 + $0x544] sm:$0xf0]  ;;  %v2835_v61 = vld [vmem:[#allocation7 + $0x544] sm:$0xf] }
 0x245   :  { %v900_v62 = vpack.c.bf16 %v898_v36, %v898_v36  ;;  %v2602_v36 = vor.u32 %v2857_v57, %v2599_v59  ;;  %v2567_v57 = vld [vmem:[#allocation7 + $0x5b8] sm:$0xf0]  ;;  %v2509_v59 = vld [vmem:[#allocation7 + $0x540] sm:$0xf] }
 0x246   :  { %v857_v63 = vpop.f32.mrf.mxu2  ;;  %v2570_v58 = vor.u32 %v2849_v55, %v2567_v57 }
 0x247   :  { %1105 = vmatmul.bf16.vlgmr.msrb.gmra.mxu2 %v900_v62  ;;  %1131 = vmatmul.bf16.vlgmr.msra.gmra.mxu0 %v900_v62  ;;  %v2855_v62 = vld [vmem:[#allocation7 + $0x5e4] sm:$0xf]  ;;  %v2591_v63 = vld [vmem:[#allocation7 + $0x5e8] sm:$0xf0] }
 0x248   :  { %1638 = vmatpush.bf16.msra.mxu1 %v2602_v36  ;;  %v2594_v35 = vor.u32 %v2855_v62, %v2591_v63  ;;  %1599 = vmatpush.bf16.msrb.mxu2 %v2534_v5  ;;  %v2510_v36 = vor.u32 %v2836_v60, %v2509_v59  ;;  %v2511_v62 = vld [vmem:[#allocation7 + $0x548] sm:$0xf0]  ;;  %v2557_v63 = vld [vmem:[#allocation7 + $0x5a0] sm:$0xf]  ;;  %v2501_v5 = vld [vmem:[#allocation7 + $0x530] sm:$0xf] }
 0x249   :  { %1625 = vmatpush.bf16.msra.mxu0 %v2538_v6  ;;  %1613 = vmatpush.bf16.msrb.mxu3 %v2590_v1  ;;  %v2514_v1 = vor.u32 %v2835_v61, %v2511_v62  ;;  %v2558_v2 = vor.u32 %v2848_v0, %v2557_v63  ;;  %v2834_v6 = vld [vmem:[#allocation7 + $0x534] sm:$0xf0]  ;;  %v1186_v59 = vperm.slane %v3119_v41, 5 }
 0x24a   :  { %v2502_v8 = vor.u32 %v2834_v6, %v2501_v5  ;;  %v2863_v5 = vld [vmem:[#allocation10 + $0x20] sm:$0xff]  ;;  %v2869_v6 = vld [vmem:[#allocation10 + $0x50] sm:$0xff] }
 0x24c   :  { %1639 = vmatpush.bf16.msra.mxu1 %v2594_v35  ;;  %1600 = vmatpush.bf16.msrb.mxu2 %v2526_v13  ;;  %v2562_v35 = vor.u32 %v2847_v3, %v2559_v4  ;;  %v2550_v13 = vor.u32 %v2846_v12, %v2549_v11  ;;  %v2860_v11 = vld [vmem:[#allocation10 + $0x8] sm:$0xff]  ;;  %v2859_v12 = vld [vmem:[#allocation10] sm:$0xff] }
 0x24d   :  { %1626 = vmatpush.bf16.msra.mxu0 %v2530_v17  ;;  %1614 = vmatpush.bf16.msrb.mxu3 %v2582_v16  ;;  %v2554_v16 = vor.u32 %v2845_v14, %v2551_v15  ;;  %v2493_v17 = vld [vmem:[#allocation7 + $0x520] sm:$0xf]  ;;  %v1438_v14 = vperm.slane %v3116_v32, 6 }
 0x250   :  { %1640 = vmatpush.bf16.msra.mxu1 %v2586_v20  ;;  %1601 = vmatpush.bf16.msrb.mxu2 %v2518_v27  ;;  %v2494_v20 = vor.u32 %v2832_v18, %v2493_v17  ;;  %v2543_v27 = vld [vmem:[#allocation7 + $0x588] sm:$0xf0] }
 0x251   :  { %1627 = vmatpush.bf16.msra.mxu0 %v2522_v28  ;;  %1615 = vmatpush.bf16.msrb.mxu3 %v2574_v30  ;;  %v2546_v28 = vor.u32 %v2843_v25, %v2543_v27  ;;  %v2830_v30 = vld [vmem:[#allocation7 + $0x514] sm:$0xf0] }
 0x254   :  { %1641 = vmatpush.bf16.msra.mxu1 %v2578_v31  ;;  %1602 = vmatpush.bf16.msrb.mxu2 %v2510_v36 }
 0x255   :  { %1616 = vmatpush.bf16.msrb.mxu3 %v2566_v56  ;;  %1628 = vmatpush.bf16.msra.mxu0 %v2514_v1 }
 0x258   :  { %1642 = vmatpush.bf16.msra.mxu1 %v2570_v58  ;;  %1603 = vmatpush.bf16.msrb.mxu2 %v2502_v8  ;;  %v2868_v8 = vld [vmem:[#allocation10 + $0x48] sm:$0xff] }
 0x259   :  { %1617 = vmatpush.bf16.msrb.mxu3 %v2558_v2  ;;  %1629 = vmatpush.bf16.msra.mxu0 %v2506_v10  ;;  %v2867_v10 = vld [vmem:[#allocation10 + $0x40] sm:$0xff] }
 0x25c   :  { %1643 = vmatpush.bf16.msra.mxu1 %v2562_v35  ;;  %1604 = vmatpush.bf16.msrb.mxu2 %v2494_v20  ;;  %v2870_v35 = vld [vmem:[#allocation10 + $0x58] sm:$0xff]  ;;  %v1437_v20 = vperm.slane %v3119_v41, 6 }
 0x25d   :  { %1618 = vmatpush.bf16.msrb.mxu3 %v2550_v13  ;;  %1630 = vmatpush.bf16.msra.mxu0 %v2498_v22 }
 0x260   :  { %1644 = vmatpush.bf16.msra.mxu1 %v2554_v16 }
 0x261   :  { %1619 = vmatpush.bf16.msrb.mxu3 %v2542_v26 }
 0x264   :  { %1645 = vmatpush.bf16.msra.mxu1 %v2546_v28 }
 0x2be   :  { %v1145_v29 = vpop.f32.mrf.mxu1 }
 0x2c4   :  { %v1119_v34 = vpop.f32.mrf.mxu3  ;;  %v1132_v37 = vpop.f32.mrf.mxu0 }
 0x2c5   :  { %v1133_v38 = vadd.f32 %v1132_v37, %v936_v33  ;;  %v2829_v33 = vld [vmem:[#allocation7 + $0x514] sm:$0xf] }
 0x2c6   :  { %v1147_v39 = vpop.f32.mrf.mxu1 }
 0x2c7   :  { %v1146_v40 = vadd.f32 %v1145_v29, %v1133_v38  ;;  %v2485_v29 = vld [vmem:[#allocation7 + $0x510] sm:$0xf]  ;;  %v2477_v38 = vld [vmem:[#allocation7 + $0x500] sm:$0xf]  ;;  %v2828_v39 = vld [vmem:[#allocation7 + $0x504] sm:$0xf0] }
 0x2c8   :  { %v2486_v31 = vor.u32 %v2830_v30, %v2485_v29 }
 0x2c9   :  { %v1150_v43 = vmax.f32 %v1146_v40, 0.0  ;;  %v2827_v40 = vld [vmem:[#allocation7 + $0x504] sm:$0xf] }
 0x2ca   :  { %v1106_v44 = vpop.f32.mrf.mxu2  ;;  %1605 = vmatpush.bf16.msrb.mxu2 %v2486_v31  ;;  %v2885_v31 = vld [vmem:[%s3137_s5] ss:$0 sm:$0xff] }
 0x2cb   :  { %v1152_v45 = vpack.c.bf16 %v1150_v43, %v1150_v43  ;;  %v1107_v46 = vadd.f32 %v1106_v44, %v935_v42  ;;  %v2478_v42 = vor.u32 %v2828_v39, %v2477_v38  ;;  %v2479_v43 = vld [vmem:[#allocation7 + $0x508] sm:$0xf0] }
 0x2cc   :  { %v1121_v47 = vpop.f32.mrf.mxu3  ;;  %v1134_v48 = vpop.f32.mrf.mxu0  ;;  %v2482_v44 = vor.u32 %v2827_v40, %v2479_v43 }
 0x2cd   :  { %v1120_v49 = vadd.f32 %v1119_v34, %v1107_v46  ;;  %1369 = vmatmul.bf16.vlgmr.msra.gmra.mxu3 %v1152_v45  ;;  %1395 = vmatmul.bf16.vlgmr.msrb.gmra.mxu1 %v1152_v45  ;;  %v2487_v34 = vld [vmem:[#allocation7 + $0x518] sm:$0xf0]  ;;  %v2874_v45 = vld [vmem:[#allocation10 + $0x78] sm:$0xff]  ;;  %v2873_v47 = vld [vmem:[#allocation10 + $0x70] sm:$0xff] }
 0x2ce   :  { %v2490_v37 = vor.u32 %v2829_v33, %v2487_v34  ;;  %1606 = vmatpush.bf16.msrb.mxu2 %v2478_v42  ;;  %v2866_v46 = vld [vmem:[#allocation10 + $0x38] sm:$0xff]  ;;  %1800 = vmatpush.bf16.msra.mxu3 %v2874_v45  ;;  %v2865_v48 = vld [vmem:[#allocation10 + $0x30] sm:$0xff] }
 0x2cf   :  { %v1149_v50 = vmax.f32 %v1120_v49, 0.0  ;;  %v2872_v49 = vld [vmem:[#allocation10 + $0x68] sm:$0xff] }
 0x2d0   :  { %1631 = vmatpush.bf16.msra.mxu0 %v2490_v37 }
 0x2d1   :  { %v1151_v51 = vpack.c.bf16 %v1149_v50, %v1149_v50  ;;  %v2864_v50 = vld [vmem:[#allocation10 + $0x28] sm:$0xff] }
 0x2d2   :  { %v1108_v52 = vpop.f32.mrf.mxu2  ;;  %1801 = vmatpush.bf16.msra.mxu3 %v2873_v47 }
 0x2d3   :  { %1356 = vmatmul.bf16.vlgmr.msra.gmra.mxu2 %v1151_v51  ;;  %1382 = vmatmul.bf16.vlgmr.msrb.gmra.mxu0 %v1151_v51  ;;  %v2871_v51 = vld [vmem:[#allocation10 + $0x60] sm:$0xff] }
 0x2d4   :  { %1632 = vmatpush.bf16.msra.mxu0 %v2482_v44  ;;  %1787 = vmatpush.bf16.msra.mxu2 %v2866_v46 }
 0x2d6   :  { %1802 = vmatpush.bf16.msra.mxu3 %v2872_v49 }
 0x2d8   :  { %1788 = vmatpush.bf16.msra.mxu2 %v2865_v48 }
 0x2da   :  { %1803 = vmatpush.bf16.msra.mxu3 %v2871_v51 }
 0x2dc   :  { %1789 = vmatpush.bf16.msra.mxu2 %v2864_v50 }
 0x2de   :  { %1804 = vmatpush.bf16.msra.mxu3 %v2870_v35 }
 0x2e0   :  { %1790 = vmatpush.bf16.msra.mxu2 %v2863_v5 }
 0x2e2   :  { %1805 = vmatpush.bf16.msra.mxu3 %v2869_v6 }
 0x2e4   :  { %1791 = vmatpush.bf16.msra.mxu2 %v2862_v7 }
 0x2e6   :  { %1806 = vmatpush.bf16.msra.mxu3 %v2868_v8 }
 0x2e8   :  { %1792 = vmatpush.bf16.msra.mxu2 %v2861_v9 }
 0x2ea   :  { %1807 = vmatpush.bf16.msra.mxu3 %v2867_v10 }
 0x2ec   :  { %1793 = vmatpush.bf16.msra.mxu2 %v2860_v11 }
 0x2f0   :  { %1794 = vmatpush.bf16.msra.mxu2 %v2859_v12 }
 0x34a   :  { %v1396_v52 = vpop.f32.mrf.mxu1 }
 0x350   :  { %v1370_v54 = vpop.f32.mrf.mxu3  ;;  %v1383_v55 = vpop.f32.mrf.mxu0 }
 0x351   :  { %v1384_v56 = vadd.f32 %v1383_v55, %v1187_v53 }
 0x352   :  { %v1398_v57 = vpop.f32.mrf.mxu1 }
 0x353   :  { %v1397_v58 = vadd.f32 %v1396_v52, %v1384_v56 }
 0x355   :  { %v1401_v60 = vmax.f32 %v1397_v58, 0.0 }
 0x356   :  { %v1357_v61 = vpop.f32.mrf.mxu2 }
 0x357   :  { %v1403_v36 = vpack.c.bf16 %v1401_v60, %v1401_v60  ;;  %v1358_v62 = vadd.f32 %v1357_v61, %v1186_v59 }
 0x358   :  { %v1372_v63 = vpop.f32.mrf.mxu3  ;;  %v1385_v0 = vpop.f32.mrf.mxu0 }
 0x359   :  { %v1371_v1 = vadd.f32 %v1370_v54, %v1358_v62  ;;  %1620 = vmatmul.bf16.vlgmr.msrb.gmra.mxu3 %v1403_v36  ;;  %1646 = vmatmul.bf16.vlgmr.msra.gmra.mxu1 %v1403_v36 }
 0x35b   :  { %v1400_v2 = vmax.f32 %v1371_v1, 0.0 }
 0x35d   :  { %v1402_v3 = vpack.c.bf16 %v1400_v2, %v1400_v2 }
 0x35e   :  { %v1359_v4 = vpop.f32.mrf.mxu2 }
 0x35f   :  { %1607 = vmatmul.bf16.vlgmr.msrb.gmra.mxu2 %v1402_v3  ;;  %1633 = vmatmul.bf16.vlgmr.msra.gmra.mxu0 %v1402_v3 }
 0x3d6   :  { %v1647_v13 = vpop.f32.mrf.mxu1 }
 0x3dc   :  { %v1621_v15 = vpop.f32.mrf.mxu3  ;;  %v1634_v16 = vpop.f32.mrf.mxu0 }
 0x3dd   :  { %v1635_v17 = vadd.f32 %v1634_v16, %v1438_v14 }
 0x3de   :  { %v1649_v18 = vpop.f32.mrf.mxu1 }
 0x3df   :  { %v1648_v19 = vadd.f32 %v1647_v13, %v1635_v17 }
 0x3e1   :  { %v1652_v21 = vmax.f32 %v1648_v19, 0.0 }
 0x3e2   :  { %v1608_v22 = vpop.f32.mrf.mxu2 }
 0x3e3   :  { %v1654_v23 = vpack.c.bf16 %v1652_v21, %v1652_v21  ;;  %v1609_v24 = vadd.f32 %v1608_v22, %v1437_v20 }
 0x3e4   :  { %v1623_v25 = vpop.f32.mrf.mxu3  ;;  %v1636_v26 = vpop.f32.mrf.mxu0 }
 0x3e5   :  { %v1622_v27 = vadd.f32 %v1621_v15, %v1609_v24  ;;  %1808 = vmatmul.bf16.vlgmr.msra.gmra.mxu3 %v1654_v23 }
 0x3e7   :  { %v1651_v28 = vmax.f32 %v1622_v27, 0.0 }
 0x3e9   :  { %v1653_v29 = vpack.c.bf16 %v1651_v28, %v1651_v28 }
 0x3ea   :  { %v1610_v30 = vpop.f32.mrf.mxu2 }
 0x3eb   :  { %1795 = vmatmul.bf16.vlgmr.msra.gmra.mxu2 %v1653_v29 }
 0x468   :  { %v1809_v32 = vpop.f32.mrf.mxu3 }
 0x46e   :  { %v1796_v33 = vpop.f32.mrf.mxu2 }
 0x46f   :  { %v1797_v41 = vadd.f32 %v2885_v31, %v1796_v33 }
 0x470   :  { %v1811_v34 = vpop.f32.mrf.mxu3 }
 0x471   :  { %v1810_v37 = vadd.f32 %v1809_v32, %v1797_v41 }
 0x473   :  { %1813 = vst [vmem:[#allocation11] sm:$0xff] %v1810_v37 }
 0x474   :  { %1824 = dma.vmem_to_hbm [thread:$0]  %s1820_s24, 128, %s1822_s27, [#allocation4]  }
 0x476   :  { %v1798_v38 = vpop.f32.mrf.mxu2 }
 0x477   :  { %3038 = dma.done.wait [#allocation4], 128  }
 0x478   :  { %3039 = vsyncadd [#allocation4], 4294967168 }
 0x479   :  { %1829 = vsyncpa [#allocation3], 1 }
 0x47a   :  { %1830 = vsyncpa [#allocation6], 1 }
 0x47b   :  { %1831 = vsyncpa [#allocation9], 1 }
 0x47c   :  { %1832 = vsyncpa [#allocation4], 1 }

</bundles_post_ra>
